<compile_context>
chip_gen: v7x
topology: tpu7x:2x2x1
jax: 0.10.0
libtpu: 0.0.40
codegen_flags: <defaults>
</compile_context>

<pallas_src>
import jax
import jax.numpy as jnp
from jax.experimental import pallas as pl
from jax.experimental.pallas import tpu as pltpu

INPUT_DIM = 100
OUTPUT_DIM = 989
HIDDEN_DIM = 128

# Padded (lane-dense) dims used inside the kernel.
IN_PAD = 128      # 100 -> 128 (K padding; zero rows in w1 keep it exact)
OUT_PAD = 1024    # 989 -> 1024 (N padding; zero cols in w4/b4 -> tanh(0)=0)


def _round_up(x, m):
    return ((x + m - 1) // m) * m


def _pick_tm(batch):
    """Adaptive batch tile.

    - multiple of 16 (bf16 sublane packing for the bf16 output tile)
    - tiny batches: a single minimal tile (no padding-proportional waste)
    - mid/large batches: >= 2 tiles so v7x's two TensorCores both get work
    - capped at 512: VMEM working set (~8 MiB incl. double buffering) fits the
      default scoped VMEM budget on v5e/v6e/v7x.
    """
    b16 = _round_up(batch, 16)
    if b16 <= 32:
        return b16
    return min(_round_up(pl.cdiv(batch, 2), 16), 512)


def generator_kernel(x_ref,
                     w1_ref, b1_ref,
                     w2_ref, b2_ref,
                     w3_ref, b3_ref,
                     w4_ref, b4_ref,
                     o_ref):
    # Layer 1: Linear(128(pad) -> 128) + ReLU
    h = jnp.dot(x_ref[...], w1_ref[...],
                preferred_element_type=jnp.float32) + b1_ref[...]
    h = jnp.maximum(h, 0.0).astype(jnp.bfloat16)
    # Layer 2: Linear(128 -> 256) + ReLU
    h = jnp.dot(h, w2_ref[...],
                preferred_element_type=jnp.float32) + b2_ref[...]
    h = jnp.maximum(h, 0.0).astype(jnp.bfloat16)
    # Layer 3: Linear(256 -> 512) + ReLU
    h = jnp.dot(h, w3_ref[...],
                preferred_element_type=jnp.float32) + b3_ref[...]
    h = jnp.maximum(h, 0.0).astype(jnp.bfloat16)
    # Layer 4: Linear(512 -> 1024(pad)) + Tanh  (pad columns are exactly 0)
    h = jnp.dot(h, w4_ref[...],
                preferred_element_type=jnp.float32) + b4_ref[...]
    # bf16 output: halves the HBM writeback (the binding cost on v6e/v7x).
    o_ref[...] = jnp.tanh(h).astype(jnp.bfloat16)


def prepare_params(params):
    """One-time pad + cast of the logical f32 params into kernel layout.

    Weights -> bf16, (in, out) layout, K of layer1 padded to 128 with zero rows,
    N of layer4 padded to 1024 with zero columns. Biases stay f32 (1, out_pad)."""
    w1 = jnp.zeros((IN_PAD, HIDDEN_DIM), jnp.float32).at[:INPUT_DIM, :].set(params["w1"])
    w4 = jnp.zeros((HIDDEN_DIM * 4, OUT_PAD), jnp.float32).at[:, :OUTPUT_DIM].set(params["w4"])
    b4 = jnp.zeros((1, OUT_PAD), jnp.float32).at[:, :OUTPUT_DIM].set(params["b4"])
    return {
        "w1": w1.astype(jnp.bfloat16), "b1": params["b1"],
        "w2": params["w2"].astype(jnp.bfloat16), "b2": params["b2"],
        "w3": params["w3"].astype(jnp.bfloat16), "b3": params["b3"],
        "w4": w4.astype(jnp.bfloat16), "b4": b4,
    }


def generator_forward_padded(x, prepared):
    """x: (B, INPUT_DIM) f32.  Returns the padded (B_pad, OUT_PAD) bf16 output.

    Preferred entry point for fused pipelines: consumers that can handle the
    padded columns/rows avoid an extra full-output slice/copy pass."""
    B = x.shape[0]
    tm = _pick_tm(B)
    n_tiles = pl.cdiv(B, tm)
    b_pad = n_tiles * tm

    # Pad batch to a TM multiple and K to 128, cast activations to bf16.
    # (Small: for the demo batch this is a 16x128 buffer.)
    x_pad = jnp.zeros((b_pad, IN_PAD), jnp.bfloat16)
    x_pad = x_pad.at[:B, :INPUT_DIM].set(x.astype(jnp.bfloat16))

    # Weights/biases: full-array blocks with a constant block index -> fetched
    # once, resident in VMEM across the whole batch grid.
    const_spec = lambda shape: pl.BlockSpec(shape, lambda i: (0, 0))

    return pl.pallas_call(
        generator_kernel,
        out_shape=jax.ShapeDtypeStruct((b_pad, OUT_PAD), jnp.bfloat16),
        grid=(n_tiles,),
        in_specs=[
            pl.BlockSpec((tm, IN_PAD), lambda i: (i, 0)),          # x tile
            const_spec((IN_PAD, HIDDEN_DIM)),                      # w1
            const_spec((1, HIDDEN_DIM)),                           # b1
            const_spec((HIDDEN_DIM, HIDDEN_DIM * 2)),              # w2
            const_spec((1, HIDDEN_DIM * 2)),                       # b2
            const_spec((HIDDEN_DIM * 2, HIDDEN_DIM * 4)),          # w3
            const_spec((1, HIDDEN_DIM * 4)),                       # b3
            const_spec((HIDDEN_DIM * 4, OUT_PAD)),                 # w4
            const_spec((1, OUT_PAD)),                              # b4
        ],
        out_specs=pl.BlockSpec((tm, OUT_PAD), lambda i: (i, 0)),
        compiler_params=pltpu.CompilerParams(
            dimension_semantics=("parallel",),
        ),
    )(x_pad,
      prepared["w1"], prepared["b1"],
      prepared["w2"], prepared["b2"],
      prepared["w3"], prepared["b3"],
      prepared["w4"], prepared["b4"])


def generator_forward(x, prepared):
    """Exact-shape forward: (B, INPUT_DIM) f32 -> (B, OUTPUT_DIM) bf16.

    Note: the [:B, :OUTPUT_DIM] slice is a separate XLA copy over the whole
    output; use generator_forward_padded() downstream when possible."""
    B = x.shape[0]
    out_pad = generator_forward_padded(x, prepared)
    return out_pad[:B, :OUTPUT_DIM]


def init_params(key):
    """Deterministic init mimicking PyTorch nn.Linear defaults (U[-1/sqrt(in), 1/sqrt(in)]).
    Weights are stored transposed: (in_features, out_features), f32."""
    dims = [(INPUT_DIM, HIDDEN_DIM),
            (HIDDEN_DIM, HIDDEN_DIM * 2),
            (HIDDEN_DIM * 2, HIDDEN_DIM * 4),
            (HIDDEN_DIM * 4, OUTPUT_DIM)]
    params = {}
    for i, (din, dout) in enumerate(dims, start=1):
        key, kw, kb = jax.random.split(key, 3)
        bound = 1.0 / jnp.sqrt(din)
        params[f"w{i}"] = jax.random.uniform(
            kw, (din, dout), jnp.float32, minval=-bound, maxval=bound)
        params[f"b{i}"] = jax.random.uniform(
            kb, (1, dout), jnp.float32, minval=-bound, maxval=bound)
    return params


def reference_forward(x, params):
    """Pure-JAX reference with the SAME bf16-input / f32-accumulate matmul
    numerics as the kernel (output kept in f32)."""
    def lin(h, w, b):
        return jnp.dot(h.astype(jnp.bfloat16), w.astype(jnp.bfloat16),
                       preferred_element_type=jnp.float32) + b
    h = jnp.maximum(lin(x, params["w1"], params["b1"]), 0.0)
    h = jnp.maximum(lin(h, params["w2"], params["b2"]), 0.0)
    h = jnp.maximum(lin(h, params["w3"], params["b3"]), 0.0)
    return jnp.tanh(lin(h, params["w4"], params["b4"]))


if __name__ == "__main__":
    key = jax.random.PRNGKey(0)
    key, kx = jax.random.split(key)
    batch = 8
    x = jax.random.normal(kx, (batch, INPUT_DIM), jnp.float32)
    params = init_params(key)
    prepared = prepare_params(params)

    out = jax.block_until_ready(generator_forward(x, prepared))
    ref = reference_forward(x, params)

    assert out.shape == (batch, OUTPUT_DIM)
    # Kernel output is bf16 (tanh in [-1, 1]); ~half-ulp of bf16 near 1 is ~2e-3.
    err = float(jnp.max(jnp.abs(out.astype(jnp.float32) - ref)))
    assert err < 1e-2, f"max abs err = {err}"
    print("KERNEL_OK")
</pallas_src>

<mosaic_0001>
module attributes {stable_mosaic.version = 11 : i64} {
  func.func @generator_kernel(%arg0: i32, %arg1: memref<16x128xbf16, #tpu.memory_space<vmem>>, %arg2: memref<128x128xbf16, #tpu.memory_space<vmem>>, %arg3: memref<1x128xf32, #tpu.memory_space<vmem>>, %arg4: memref<128x256xbf16, #tpu.memory_space<vmem>>, %arg5: memref<1x256xf32, #tpu.memory_space<vmem>>, %arg6: memref<256x512xbf16, #tpu.memory_space<vmem>>, %arg7: memref<1x512xf32, #tpu.memory_space<vmem>>, %arg8: memref<512x1024xbf16, #tpu.memory_space<vmem>>, %arg9: memref<1x1024xf32, #tpu.memory_space<vmem>>, %arg10: memref<16x1024xbf16, #tpu.memory_space<vmem>>) attributes {dimension_semantics = [#tpu.dimension_semantics<parallel>], iteration_bounds = array<i64: 1>, scalar_prefetch = 0 : i64, scratch_operands = 0 : i64, tpu.core_type = #tpu.core_type<tc>, window_params = [{transform_indices = @transform_0, window_bounds = array<i64: 16, 128>}, {pipeline_mode = #tpu.pipeline_mode<synchronous>, transform_indices = @transform_1, window_bounds = array<i64: 128, 128>}, {pipeline_mode = #tpu.pipeline_mode<synchronous>, transform_indices = @transform_2, window_bounds = array<i64: 1, 128>}, {pipeline_mode = #tpu.pipeline_mode<synchronous>, transform_indices = @transform_3, window_bounds = array<i64: 128, 256>}, {pipeline_mode = #tpu.pipeline_mode<synchronous>, transform_indices = @transform_4, window_bounds = array<i64: 1, 256>}, {pipeline_mode = #tpu.pipeline_mode<synchronous>, transform_indices = @transform_5, window_bounds = array<i64: 256, 512>}, {pipeline_mode = #tpu.pipeline_mode<synchronous>, transform_indices = @transform_6, window_bounds = array<i64: 1, 512>}, {pipeline_mode = #tpu.pipeline_mode<synchronous>, transform_indices = @transform_7, window_bounds = array<i64: 512, 1024>}, {pipeline_mode = #tpu.pipeline_mode<synchronous>, transform_indices = @transform_8, window_bounds = array<i64: 1, 1024>}, {transform_indices = @transform_9, window_bounds = array<i64: 16, 1024>}]} {
    %c0 = arith.constant 0 : index
    %c0_0 = arith.constant 0 : index
    %0 = vector.load %arg1[%c0, %c0_0] : memref<16x128xbf16, #tpu.memory_space<vmem>>, vector<16x128xbf16>
    %c0_1 = arith.constant 0 : index
    %c0_2 = arith.constant 0 : index
    %1 = vector.load %arg2[%c0_1, %c0_2] : memref<128x128xbf16, #tpu.memory_space<vmem>>, vector<128x128xbf16>
    %cst = arith.constant dense<0.000000e+00> : vector<16x128xf32>
    %2 = tpu.matmul %0, %1, %cst {dimension_numbers = #tpu.dot_dimension_numbers<[1], [0], [0], [1], [0, 0, 1, 1], [], []>} : vector<16x128xbf16>, vector<128x128xbf16>, vector<16x128xf32> -> vector<16x128xf32>
    %c0_3 = arith.constant 0 : index
    %c0_4 = arith.constant 0 : index
    %3 = vector.load %arg3[%c0_3, %c0_4] : memref<1x128xf32, #tpu.memory_space<vmem>>, vector<1x128xf32>
    %4 = vector.broadcast %3 : vector<1x128xf32> to vector<16x128xf32>
    %5 = arith.addf %2, %4 : vector<16x128xf32>
    %cst_5 = arith.constant 0.000000e+00 : f32
    %6 = vector.broadcast %cst_5 : f32 to vector<16x128xf32>
    %7 = arith.maximumf %5, %6 : vector<16x128xf32>
    %8 = arith.truncf %7 : vector<16x128xf32> to vector<16x128xbf16>
    %c0_6 = arith.constant 0 : index
    %c0_7 = arith.constant 0 : index
    %9 = vector.load %arg4[%c0_6, %c0_7] : memref<128x256xbf16, #tpu.memory_space<vmem>>, vector<128x256xbf16>
    %cst_8 = arith.constant dense<0.000000e+00> : vector<16x256xf32>
    %10 = tpu.matmul %8, %9, %cst_8 {dimension_numbers = #tpu.dot_dimension_numbers<[1], [0], [0], [1], [0, 0, 1, 1], [], []>} : vector<16x128xbf16>, vector<128x256xbf16>, vector<16x256xf32> -> vector<16x256xf32>
    %c0_9 = arith.constant 0 : index
    %c0_10 = arith.constant 0 : index
    %11 = vector.load %arg5[%c0_9, %c0_10] : memref<1x256xf32, #tpu.memory_space<vmem>>, vector<1x256xf32>
    %12 = vector.broadcast %11 : vector<1x256xf32> to vector<16x256xf32>
    %13 = arith.addf %10, %12 : vector<16x256xf32>
    %cst_11 = arith.constant 0.000000e+00 : f32
    %14 = vector.broadcast %cst_11 : f32 to vector<16x256xf32>
    %15 = arith.maximumf %13, %14 : vector<16x256xf32>
    %16 = arith.truncf %15 : vector<16x256xf32> to vector<16x256xbf16>
    %c0_12 = arith.constant 0 : index
    %c0_13 = arith.constant 0 : index
    %17 = vector.load %arg6[%c0_12, %c0_13] : memref<256x512xbf16, #tpu.memory_space<vmem>>, vector<256x512xbf16>
    %cst_14 = arith.constant dense<0.000000e+00> : vector<16x512xf32>
    %18 = tpu.matmul %16, %17, %cst_14 {dimension_numbers = #tpu.dot_dimension_numbers<[1], [0], [0], [1], [0, 0, 1, 1], [], []>} : vector<16x256xbf16>, vector<256x512xbf16>, vector<16x512xf32> -> vector<16x512xf32>
    %c0_15 = arith.constant 0 : index
    %c0_16 = arith.constant 0 : index
    %19 = vector.load %arg7[%c0_15, %c0_16] : memref<1x512xf32, #tpu.memory_space<vmem>>, vector<1x512xf32>
    %20 = vector.broadcast %19 : vector<1x512xf32> to vector<16x512xf32>
    %21 = arith.addf %18, %20 : vector<16x512xf32>
    %cst_17 = arith.constant 0.000000e+00 : f32
    %22 = vector.broadcast %cst_17 : f32 to vector<16x512xf32>
    %23 = arith.maximumf %21, %22 : vector<16x512xf32>
    %24 = arith.truncf %23 : vector<16x512xf32> to vector<16x512xbf16>
    %c0_18 = arith.constant 0 : index
    %c0_19 = arith.constant 0 : index
    %25 = vector.load %arg8[%c0_18, %c0_19] : memref<512x1024xbf16, #tpu.memory_space<vmem>>, vector<512x1024xbf16>
    %cst_20 = arith.constant dense<0.000000e+00> : vector<16x1024xf32>
    %26 = tpu.matmul %24, %25, %cst_20 {dimension_numbers = #tpu.dot_dimension_numbers<[1], [0], [0], [1], [0, 0, 1, 1], [], []>} : vector<16x512xbf16>, vector<512x1024xbf16>, vector<16x1024xf32> -> vector<16x1024xf32>
    %c0_21 = arith.constant 0 : index
    %c0_22 = arith.constant 0 : index
    %27 = vector.load %arg9[%c0_21, %c0_22] : memref<1x1024xf32, #tpu.memory_space<vmem>>, vector<1x1024xf32>
    %28 = vector.broadcast %27 : vector<1x1024xf32> to vector<16x1024xf32>
    %29 = arith.addf %26, %28 : vector<16x1024xf32>
    %30 = math.tanh %29 : vector<16x1024xf32>
    %31 = arith.truncf %30 : vector<16x1024xf32> to vector<16x1024xbf16>
    %c0_23 = arith.constant 0 : index
    %c0_24 = arith.constant 0 : index
    %32 = vector.load %arg10[%c0_23, %c0_24] : memref<16x1024xbf16, #tpu.memory_space<vmem>>, vector<16x1024xbf16>
    tpu.vector_store %arg10[%c0_23, %c0_24], %31 {strides = array<i32>} : memref<16x1024xbf16, #tpu.memory_space<vmem>>, vector<16x1024xbf16>,
    return
  }
  func.func @transform_0(%arg0: i32) -> (i32, i32) {
    %c0_i32 = arith.constant 0 : i32
    %c0_i32_0 = arith.constant 0 : i32
    return %arg0, %c0_i32 : i32, i32
  }
  func.func @transform_1(%arg0: i32) -> (i32, i32) {
    %c0_i32 = arith.constant 0 : i32
    %c0_i32_0 = arith.constant 0 : i32
    %c0_i32_1 = arith.constant 0 : i32
    return %c0_i32, %c0_i32_0 : i32, i32
  }
  func.func @transform_2(%arg0: i32) -> (i32, i32) {
    %c0_i32 = arith.constant 0 : i32
    %c0_i32_0 = arith.constant 0 : i32
    %c0_i32_1 = arith.constant 0 : i32
    return %c0_i32, %c0_i32_0 : i32, i32
  }
  func.func @transform_3(%arg0: i32) -> (i32, i32) {
    %c0_i32 = arith.constant 0 : i32
    %c0_i32_0 = arith.constant 0 : i32
    %c0_i32_1 = arith.constant 0 : i32
    return %c0_i32, %c0_i32_0 : i32, i32
  }
  func.func @transform_4(%arg0: i32) -> (i32, i32) {
    %c0_i32 = arith.constant 0 : i32
    %c0_i32_0 = arith.constant 0 : i32
    %c0_i32_1 = arith.constant 0 : i32
    return %c0_i32, %c0_i32_0 : i32, i32
  }
  func.func @transform_5(%arg0: i32) -> (i32, i32) {
    %c0_i32 = arith.constant 0 : i32
    %c0_i32_0 = arith.constant 0 : i32
    %c0_i32_1 = arith.constant 0 : i32
    return %c0_i32, %c0_i32_0 : i32, i32
  }
  func.func @transform_6(%arg0: i32) -> (i32, i32) {
    %c0_i32 = arith.constant 0 : i32
    %c0_i32_0 = arith.constant 0 : i32
    %c0_i32_1 = arith.constant 0 : i32
    return %c0_i32, %c0_i32_0 : i32, i32
  }
  func.func @transform_7(%arg0: i32) -> (i32, i32) {
    %c0_i32 = arith.constant 0 : i32
    %c0_i32_0 = arith.constant 0 : i32
    %c0_i32_1 = arith.constant 0 : i32
    return %c0_i32, %c0_i32_0 : i32, i32
  }
  func.func @transform_8(%arg0: i32) -> (i32, i32) {
    %c0_i32 = arith.constant 0 : i32
    %c0_i32_0 = arith.constant 0 : i32
    %c0_i32_1 = arith.constant 0 : i32
    return %c0_i32, %c0_i32_0 : i32, i32
  }
  func.func @transform_9(%arg0: i32) -> (i32, i32) {
    %c0_i32 = arith.constant 0 : i32
    %c0_i32_0 = arith.constant 0 : i32
    return %arg0, %c0_i32 : i32, i32
  }
}

</mosaic_0001>

<bundles_post_ra>
// kernel: tpu_custom_call.1
= control target key start
LH: loop header
LB: loop body
LE: loop exit
PB: predicated region body
PF: predicated region fallthrough
CT: control target
= control target key end

     0   :  { %14 = vsyncpa [#allocation3], 0  ;;  %s3869_s0 = inlined_call_operand.hbm [shape: bf16[16,128], index: 0, kind: input, shape index: {}]   ;;  %s3870_s1 = inlined_call_operand.hbm [shape: bf16[128,128], index: 1, kind: input, shape index: {}]   ;;  %s3871_s2 = inlined_call_operand.vmem [shape: f32[1,128], index: 2, kind: input, shape index: {}]   ;;  %s3872_s3 = inlined_call_operand.hbm [shape: bf16[128,256], index: 3, kind: input, shape index: {}]   ;;  %s3873_s4 = inlined_call_operand.vmem [shape: f32[1,256], index: 4, kind: input, shape index: {}]   ;;  %s3874_s5 = inlined_call_operand.hbm [shape: bf16[256,512], index: 5, kind: input, shape index: {}]   ;;  %s3875_s6 = inlined_call_operand.vmem [shape: f32[1,512], index: 6, kind: input, shape index: {}]   ;;  %s3876_s7 = inlined_call_operand.hbm [shape: bf16[512,1024], index: 7, kind: input, shape index: {}]   ;;  %s3877_s8 = inlined_call_operand.vmem [shape: f32[1,1024], index: 8, kind: input, shape index: {}]   ;;  %s3878_s9 = inlined_call_operand.hbm [shape: bf16[16,1024], index: 9, kind: output, shape index: {}]  }
   0x1   :  { %15 = vsyncpa [#allocation6], 0 }
   0x2   :  { %16 = vsyncpa [#allocation9], 0 }
   0x3   :  { %17 = vsyncpa [#allocation4], 0  ;;  %s3640_s30 = smov [#allocation5]   ;;  %s3641_s11 = smov [#allocation8]  }
   0x4   :  { %s35_s10 = sshll.u32 %s3640_s30, 4  ;;  %s63_s12 = sshll.u32 %s3641_s11, 4  ;;  %s36_s10 = int_to_ptr.vmem [resolvable:$true] %s35_s10  ;;  %s3707_s12 = int_to_ptr.vmem [resolvable:$true] %s63_s12 }
   0x5   :  { %s3500_s15 = scalar_lea.hbm %s3870_s1, 1024 }
   0x6   :  { %p3501_p0 = scmp.ne.s32.totalorder %s3870_s1, %s3500_s15  ;;  %p3504_p1 = scmp.lt.u32.totalorder %s3500_s15, %s3870_s1 }
   0x8   :  { %p3506_p2 = pnand %p3504_p1, %p3501_p0 }
   0xa   :  { %3509 = shalt.err (!%p3506_p2)
}
   0xb   :  { %s3510_s20 = scalar_lea.vmem %s36_s10, 1024  ;;  %p3515_p4 = scmp.lt.s32.totalorder %s36_s10, %s36_s10 }
   0xc   :  { %p3511_p3 = scmp.ne.s32.totalorder %s36_s10, %s3510_s20  ;;  %p3516_p5 = scmp.lt.s32.totalorder %s3510_s20, %s3510_s20 }
   0xe   :  { %p3517_p6 = por %p3516_p5, %p3515_p4 }
  0x10   :  { %p3518_p7 = pnand %p3517_p6, %p3511_p3 }
  0x12   :  { %3521 = shalt.err (!%p3518_p7)
}
  0x13   :  { %s3642_s21 = smov 64   ;;  %s3643_s22 = smov 4  }
  0x14   :  { %41 = dma.hbm_to_vmem [thread:$0]  %s3870_s1, 1024, %s36_s10, [#allocation6], %s3642_s21, %s3642_s21, %s3643_s22  }
  0x15   :  { %s3522_s27 = scalar_lea.hbm %s3874_s5, 8192 }
  0x16   :  { %p3523_p8 = scmp.ne.s32.totalorder %s3874_s5, %s3522_s27  ;;  %p3526_p9 = scmp.lt.u32.totalorder %s3522_s27, %s3874_s5 }
  0x18   :  { %p3528_p10 = pnand %p3526_p9, %p3523_p8 }
  0x1a   :  { %3531 = shalt.err (!%p3528_p10)
}
  0x1b   :  { %s3532_s13 = scalar_lea.vmem %s3707_s12, 8192  ;;  %p3537_p12 = scmp.lt.s32.totalorder %s3707_s12, %s3707_s12 }
  0x1c   :  { %p3533_p11 = scmp.ne.s32.totalorder %s3707_s12, %s3532_s13  ;;  %p3538_p13 = scmp.lt.s32.totalorder %s3532_s13, %s3532_s13 }
  0x1e   :  { %p3539_p0 = por %p3538_p13, %p3537_p12 }
  0x20   :  { %p3540_p1 = pnand %p3539_p0, %p3533_p11 }
  0x22   :  { %3543 = shalt.err (!%p3540_p1)
}
  0x23   :  { %s3644_s1 = smov 256   ;;  %s3645_s10 = smov 16  }
  0x24   :  { %69 = dma.hbm_to_vmem [thread:$0]  %s3874_s5, 8192, %s3707_s12, [#allocation9], %s3644_s1, %s3644_s1, %s3645_s10  }
  0x25   :  { %s3646_s16 = smov [#allocation2]   ;;  %s3647_s18 = smov [#allocation7]  }
  0x26   :  { %s23_s17 = sshll.u32 %s3646_s16, 4  ;;  %s49_s19 = sshll.u32 %s3647_s18, 4  ;;  %s24_s17 = int_to_ptr.vmem [resolvable:$true] %s23_s17  ;;  %s3741_s19 = int_to_ptr.vmem [resolvable:$true] %s49_s19 }
  0x27   :  { %s3544_s24 = scalar_lea.hbm %s3869_s0, 128 }
  0x28   :  { %p3545_p2 = scmp.ne.s32.totalorder %s3869_s0, %s3544_s24  ;;  %p3548_p3 = scmp.lt.u32.totalorder %s3544_s24, %s3869_s0 }
  0x2a   :  { %p3550_p4 = pnand %p3548_p3, %p3545_p2 }
  0x2c   :  { %3553 = shalt.err (!%p3550_p4)
}
  0x2d   :  { %s3554_s5 = scalar_lea.vmem %s24_s17, 128  ;;  %p3559_p6 = scmp.lt.s32.totalorder %s24_s17, %s24_s17 }
  0x2e   :  { %p3555_p5 = scmp.ne.s32.totalorder %s24_s17, %s3554_s5  ;;  %p3560_p7 = scmp.lt.s32.totalorder %s3554_s5, %s3554_s5 }
  0x30   :  { %p3561_p8 = por %p3560_p7, %p3559_p6 }
  0x32   :  { %p3562_p9 = pnand %p3561_p8, %p3555_p5 }
  0x34   :  { %3565 = shalt.err (!%p3562_p9)
}
  0x35   :  { %29 = dma.hbm_to_vmem [thread:$0]  %s3869_s0, 128, %s24_s17, [#allocation3], %s3642_s21, %s3642_s21, %s3643_s22  }
  0x36   :  { %s3566_s13 = scalar_lea.hbm %s3872_s3, 2048 }
  0x37   :  { %p3567_p10 = scmp.ne.s32.totalorder %s3872_s3, %s3566_s13  ;;  %p3570_p11 = scmp.lt.u32.totalorder %s3566_s13, %s3872_s3 }
  0x39   :  { %p3572_p12 = pnand %p3570_p11, %p3567_p10 }
  0x3b   :  { %3575 = shalt.err (!%p3572_p12)
}
  0x3c   :  { %s3576_s16 = scalar_lea.vmem %s3741_s19, 2048  ;;  %p3581_p0 = scmp.lt.s32.totalorder %s3741_s19, %s3741_s19 }
  0x3d   :  { %p3577_p13 = scmp.ne.s32.totalorder %s3741_s19, %s3576_s16  ;;  %p3582_p1 = scmp.lt.s32.totalorder %s3576_s16, %s3576_s16 }
  0x3f   :  { %p3583_p2 = por %p3582_p1, %p3581_p0 }
  0x41   :  { %p3584_p3 = pnand %p3583_p2, %p3577_p13 }
  0x43   :  { %3587 = shalt.err (!%p3584_p3)
}
  0x44   :  { %s3648_s0 = smov 128   ;;  %s3649_s21 = smov 8  }
  0x45   :  { %55 = dma.hbm_to_vmem [thread:$0]  %s3872_s3, 2048, %s3741_s19, [#allocation6], %s3648_s0, %s3648_s0, %s3649_s21  }
  0x46   :  { %s3650_s18 = smov [#allocation10]   ;;  %s3588_s25 = scalar_lea.hbm %s3876_s7, 32768 }
  0x47   :  { %s77_s20 = sshll.u32 %s3650_s18, 4  ;;  %p3589_p4 = scmp.ne.s32.totalorder %s3876_s7, %s3588_s25  ;;  %s78_s20 = int_to_ptr.vmem [resolvable:$true] %s77_s20 }
  0x48   :  { %p3592_p5 = scmp.lt.u32.totalorder %s3588_s25, %s3876_s7 }
  0x4a   :  { %p3594_p6 = pnand %p3592_p5, %p3589_p4 }
  0x4c   :  { %3597 = shalt.err (!%p3594_p6)
}
  0x4d   :  { %s3598_s12 = scalar_lea.vmem %s78_s20, 32768  ;;  %p3603_p8 = scmp.lt.s32.totalorder %s78_s20, %s78_s20 }
  0x4e   :  { %p3599_p7 = scmp.ne.s32.totalorder %s78_s20, %s3598_s12  ;;  %p3604_p9 = scmp.lt.s32.totalorder %s3598_s12, %s3598_s12 }
  0x50   :  { %p3605_p10 = por %p3604_p9, %p3603_p8 }
  0x52   :  { %p3606_p11 = pnand %p3605_p10, %p3599_p7 }
  0x54   :  { %3609 = shalt.err (!%p3606_p11)
}
  0x55   :  { %s3651_s3 = smov 512   ;;  %s3652_s19 = smov 32  }
  0x56   :  { %83 = dma.hbm_to_vmem [thread:$0]  %s3876_s7, 32768, %s78_s20, [#allocation9], %s3651_s3, %s3651_s3, %s3652_s19  }
  0x57   :  { %3632 = dma.done.wait [#allocation3], 128  }
  0x58   :  { %3633 = vsyncadd [#allocation3], 4294967168 }
  0x59   :  { %3634 = dma.done.wait [#allocation6], 3072  }
  0x5a   :  { %3635 = vsyncadd [#allocation6], 4294964224 }
  0x5b   :  { %3636 = dma.done.wait [#allocation9], 40960  }
  0x5c   :  { %3637 = vsyncadd [#allocation9], 4294926336  ;;  %v3653_v0 = vmov 0.0   ;;  %vm3654_vm0 = vmmov 0   ;;  %v3339_v1 = vld [vmem:[#allocation5] sm:$0xff]   ;;  %v3340_v2 = vld [vmem:[#allocation5 + $0x8] sm:$0xff]  }
  0x5d   :  { %3270 = vmatprep.subr.bf16.mxu0 %v3653_v0  ;;  %3286 = vmatprep.mubr.msk.bf16.mxu0 %vm3654_vm0, %v3653_v0  ;;  %v3341_v3 = vld [vmem:[#allocation5 + $0x10] sm:$0xff]   ;;  %v3342_v4 = vld [vmem:[#allocation5 + $0x18] sm:$0xff]   ;;  %v3348_v5 = vld [vmem:[#allocation7 + $0x4] ss:$8 sps:$4 sm:$0xff]   ;;  %v3655_v26 = vmov 0  }
  0x5e   :  { %3271 = vmatpush3.bf16.msra.mxu0 %v3339_v1  ;;  %v3350_v6 = vld [vmem:[#allocation7] ss:$8 sps:$4 sm:$0xff]   ;;  %333 = vmatprep.subr.bf16.mxu1 %v3348_v5  ;;  %v3351_v7 = vld [vmem:[#allocation7 + $0x14] ss:$8 sps:$4 sm:$0xff]   ;;  %v3353_v8 = vld [vmem:[#allocation7 + $0x10] ss:$8 sps:$4 sm:$0xff]  }
  0x5f   :  { %3272 = vmatprep.subr.bf16.mxu0 %v3653_v0  ;;  %334 = vmatpush1.bf16.msra.mxu1 %v3350_v6  ;;  %v3354_v9 = vld [vmem:[#allocation7 + $0x24] ss:$8 sps:$4 sm:$0xff]   ;;  %v3356_v12 = vld [vmem:[#allocation7 + $0x20] ss:$8 sps:$4 sm:$0xff]   ;;  %v3357_v13 = vld [vmem:[#allocation7 + $0x34] ss:$8 sps:$4 sm:$0xff]  }
  0x60   :  { %335 = vmatprep.subr.bf16.mxu1 %v3351_v7  ;;  %v3343_v10 = vld [vmem:[#allocation5 + $0x20] sm:$0xff]   ;;  %v3344_v11 = vld [vmem:[#allocation5 + $0x28] sm:$0xff]   ;;  %v3359_v14 = vld [vmem:[#allocation7 + $0x30] ss:$8 sps:$4 sm:$0xff]   ;;  %365 = vmatprep.mubr.bf16.mxu1 %v3655_v26 }
  0x61   :  { %v3360_v15 = vld [vmem:[#allocation7 + $0x44] ss:$8 sps:$4 sm:$0xff]   ;;  %v3345_v16 = vld [vmem:[#allocation5 + $0x30] sm:$0xff]   ;;  %v3362_v17 = vld [vmem:[#allocation7 + $0x40] ss:$8 sps:$4 sm:$0xff]  }
  0x62   :  { %3273 = vmatpush3.bf16.msra.mxu0 %v3340_v2  ;;  %v3363_v18 = vld [vmem:[#allocation7 + $0x54] ss:$8 sps:$4 sm:$0xff]   ;;  %v3365_v20 = vld [vmem:[#allocation7 + $0x50] ss:$8 sps:$4 sm:$0xff]   ;;  %v3366_v22 = vld [vmem:[#allocation7 + $0x64] ss:$8 sps:$4 sm:$0xff]  }
  0x63   :  { %3274 = vmatprep.subr.bf16.mxu0 %v3653_v0  ;;  %336 = vmatpush1.bf16.msra.mxu1 %v3353_v8  ;;  %v3346_v19 = vld [vmem:[#allocation5 + $0x38] sm:$0xff]   ;;  %v3368_v23 = vld [vmem:[#allocation7 + $0x60] ss:$8 sps:$4 sm:$0xff]   ;;  %v3374_v28 = vld [vmem:[#allocation8 + $0x4] ss:$16 sps:$4 sm:$0xff]  }
  0x64   :  { %337 = vmatprep.subr.bf16.mxu1 %v3354_v9  ;;  %v3347_v21 = vld [vmem:[#allocation2] sm:$0xff]   ;;  %v3372_v27 = vld [vmem:[#allocation8] ss:$16 sps:$4 sm:$0xff]   ;;  %v3380_v30 = vld [vmem:[#allocation8 + $0x24] ss:$16 sps:$4 sm:$0xff]  }
  0x65   :  { %v3369_v24 = vld [vmem:[#allocation7 + $0x74] ss:$8 sps:$4 sm:$0xff]   ;;  %v3371_v25 = vld [vmem:[#allocation7 + $0x70] ss:$8 sps:$4 sm:$0xff]  }
  0x66   :  { %3275 = vmatpush3.bf16.msra.mxu0 %v3341_v3  ;;  %v3377_v29 = vld [vmem:[#allocation8 + $0xc] ss:$16 sps:$4 sm:$0xff]   ;;  %v3378_v31 = vld [vmem:[#allocation8 + $0x20] ss:$16 sps:$4 sm:$0xff]   ;;  %v3386_v32 = vld [vmem:[#allocation8 + $0x44] ss:$16 sps:$4 sm:$0xff]  }
  0x67   :  { %3276 = vmatprep.subr.bf16.mxu0 %v3653_v0  ;;  %338 = vmatpush1.bf16.msra.mxu1 %v3356_v12  ;;  %v3384_v33 = vld [vmem:[#allocation8 + $0x40] ss:$16 sps:$4 sm:$0xff]   ;;  %v3392_v34 = vld [vmem:[#allocation8 + $0x64] ss:$16 sps:$4 sm:$0xff]   ;;  %v2899_v56 = vld [vmem:[%s3871_s2] ss:$0 sm:$0xff] }
  0x68   :  { %339 = vmatprep.subr.bf16.mxu1 %v3357_v13  ;;  %v3390_v35 = vld [vmem:[#allocation8 + $0x60] ss:$16 sps:$4 sm:$0xff]   ;;  %v3398_v36 = vld [vmem:[#allocation8 + $0x84] ss:$16 sps:$4 sm:$0xff]   ;;  %v3375_v1 = vld [vmem:[#allocation8 + $0x8] ss:$16 sps:$4 sm:$0xff]  }
  0x69   :  { %v3396_v37 = vld [vmem:[#allocation8 + $0x80] ss:$16 sps:$4 sm:$0xff]   ;;  %v3404_v38 = vld [vmem:[#allocation8 + $0xa4] ss:$16 sps:$4 sm:$0xff]   ;;  %v3383_v3 = vld [vmem:[#allocation8 + $0x2c] ss:$16 sps:$4 sm:$0xff]  }
  0x6a   :  { %3277 = vmatpush3.bf16.msra.mxu0 %v3342_v4  ;;  %v3402_v39 = vld [vmem:[#allocation8 + $0xa0] ss:$16 sps:$4 sm:$0xff]   ;;  %v3410_v40 = vld [vmem:[#allocation8 + $0xc4] ss:$16 sps:$4 sm:$0xff]   ;;  %v3381_v4 = vld [vmem:[#allocation8 + $0x28] ss:$16 sps:$4 sm:$0xff]  }
  0x6b   :  { %3278 = vmatprep.subr.bf16.mxu0 %v3653_v0  ;;  %340 = vmatpush1.bf16.msra.mxu1 %v3359_v14  ;;  %v3408_v41 = vld [vmem:[#allocation8 + $0xc0] ss:$16 sps:$4 sm:$0xff]   ;;  %v3416_v42 = vld [vmem:[#allocation8 + $0xe4] ss:$16 sps:$4 sm:$0xff]   ;;  %v3389_v5 = vld [vmem:[#allocation8 + $0x4c] ss:$16 sps:$4 sm:$0xff]  }
  0x6c   :  { %341 = vmatprep.subr.bf16.mxu1 %v3360_v15  ;;  %v3414_v43 = vld [vmem:[#allocation8 + $0xe0] ss:$16 sps:$4 sm:$0xff]   ;;  %v3422_v44 = vld [vmem:[#allocation8 + $0x104] ss:$16 sps:$4 sm:$0xff]   ;;  %v3387_v6 = vld [vmem:[#allocation8 + $0x48] ss:$16 sps:$4 sm:$0xff]  }
  0x6d   :  { %v3420_v45 = vld [vmem:[#allocation8 + $0x100] ss:$16 sps:$4 sm:$0xff]   ;;  %v3428_v46 = vld [vmem:[#allocation8 + $0x124] ss:$16 sps:$4 sm:$0xff]   ;;  %v3395_v7 = vld [vmem:[#allocation8 + $0x6c] ss:$16 sps:$4 sm:$0xff]  }
  0x6e   :  { %3279 = vmatpush3.bf16.msra.mxu0 %v3343_v10  ;;  %v3426_v47 = vld [vmem:[#allocation8 + $0x120] ss:$16 sps:$4 sm:$0xff]   ;;  %v3434_v48 = vld [vmem:[#allocation8 + $0x144] ss:$16 sps:$4 sm:$0xff]   ;;  %v3393_v8 = vld [vmem:[#allocation8 + $0x68] ss:$16 sps:$4 sm:$0xff]  }
  0x6f   :  { %3280 = vmatprep.subr.bf16.mxu0 %v3653_v0  ;;  %342 = vmatpush1.bf16.msra.mxu1 %v3362_v17  ;;  %v3432_v49 = vld [vmem:[#allocation8 + $0x140] ss:$16 sps:$4 sm:$0xff]   ;;  %v3440_v50 = vld [vmem:[#allocation8 + $0x164] ss:$16 sps:$4 sm:$0xff]   ;;  %v3401_v9 = vld [vmem:[#allocation8 + $0x8c] ss:$16 sps:$4 sm:$0xff]  }
  0x70   :  { %343 = vmatprep.subr.bf16.mxu1 %v3363_v18  ;;  %v3438_v51 = vld [vmem:[#allocation8 + $0x160] ss:$16 sps:$4 sm:$0xff]   ;;  %v3446_v52 = vld [vmem:[#allocation8 + $0x184] ss:$16 sps:$4 sm:$0xff]   ;;  %v3399_v10 = vld [vmem:[#allocation8 + $0x88] ss:$16 sps:$4 sm:$0xff]  }
  0x71   :  { %v3444_v53 = vld [vmem:[#allocation8 + $0x180] ss:$16 sps:$4 sm:$0xff]   ;;  %v3452_v54 = vld [vmem:[#allocation8 + $0x1a4] ss:$16 sps:$4 sm:$0xff]   ;;  %v3405_v12 = vld [vmem:[#allocation8 + $0xa8] ss:$16 sps:$4 sm:$0xff]  }
  0x72   :  { %3281 = vmatpush3.bf16.msra.mxu0 %v3344_v11  ;;  %v3450_v55 = vld [vmem:[#allocation8 + $0x1a0] ss:$16 sps:$4 sm:$0xff]   ;;  %v3407_v11 = vld [vmem:[#allocation8 + $0xac] ss:$16 sps:$4 sm:$0xff]   ;;  %v3411_v14 = vld [vmem:[#allocation8 + $0xc8] ss:$16 sps:$4 sm:$0xff]  }
  0x73   :  { %3282 = vmatprep.subr.bf16.mxu0 %v3653_v0  ;;  %344 = vmatpush1.bf16.msra.mxu1 %v3365_v20  ;;  %v3413_v13 = vld [vmem:[#allocation8 + $0xcc] ss:$16 sps:$4 sm:$0xff]   ;;  %v3423_v18 = vld [vmem:[#allocation8 + $0x108] ss:$16 sps:$4 sm:$0xff]  }
  0x74   :  { %345 = vmatprep.subr.bf16.mxu1 %v3366_v22  ;;  %v3419_v15 = vld [vmem:[#allocation8 + $0xec] ss:$16 sps:$4 sm:$0xff]   ;;  %v3429_v20 = vld [vmem:[#allocation8 + $0x128] ss:$16 sps:$4 sm:$0xff]  }
  0x75   :  { %v3425_v17 = vld [vmem:[#allocation8 + $0x10c] ss:$16 sps:$4 sm:$0xff]   ;;  %v3435_v22 = vld [vmem:[#allocation8 + $0x148] ss:$16 sps:$4 sm:$0xff]  }
  0x76   :  { %3283 = vmatpush3.bf16.msra.mxu0 %v3345_v16  ;;  %v3417_v16 = vld [vmem:[#allocation8 + $0xe8] ss:$16 sps:$4 sm:$0xff]  }
  0x77   :  { %3284 = vmatprep.subr.bf16.mxu0 %v3653_v0  ;;  %346 = vmatpush1.bf16.msra.mxu1 %v3368_v23  ;;  %v3443_v23 = vld [vmem:[#allocation8 + $0x16c] ss:$16 sps:$4 sm:$0xff]   ;;  %v3447_v26 = vld [vmem:[#allocation8 + $0x188] ss:$16 sps:$4 sm:$0xff]  }
  0x78   :  { %347 = vmatprep.subr.bf16.mxu1 %v3369_v24  ;;  %v3441_v24 = vld [vmem:[#allocation8 + $0x168] ss:$16 sps:$4 sm:$0xff]  }
  0x7a   :  { %3285 = vmatpush3.bf16.msra.mxu0 %v3346_v19  ;;  %v3431_v19 = vld [vmem:[#allocation8 + $0x12c] ss:$16 sps:$4 sm:$0xff]  }
  0x7b   :  { %348 = vmatpush1.bf16.msra.mxu1 %v3371_v25  ;;  %788 = vmatprep.subr.bf16.mxu0 %v3374_v28  ;;  %v3449_v25 = vld [vmem:[#allocation8 + $0x18c] ss:$16 sps:$4 sm:$0xff]   ;;  %v3453_v28 = vld [vmem:[#allocation8 + $0x1a8] ss:$16 sps:$4 sm:$0xff]  }
  0x7c   :  { %831 = vmatprep.subr.bf16.mxu1 %v3377_v29  ;;  %v3458_v29 = vld [vmem:[#allocation8 + $0x1c4] ss:$16 sps:$4 sm:$0xff]  }
  0x7d   :  { %3287 = vmatmul.mubr.bf16.vlgmr.msra.gmra.mrb[0].mxu0 %v3347_v21  ;;  %v3437_v21 = vld [vmem:[#allocation8 + $0x14c] ss:$16 sps:$4 sm:$0xff]  }
  0x7e   :  { %789 = vmatpush1.bf16.msra.mxu0 %v3372_v27  ;;  %v3455_v27 = vld [vmem:[#allocation8 + $0x1ac] ss:$16 sps:$4 sm:$0xff]  }
  0x7f   :  { %790 = vmatprep.subr.bf16.mxu0 %v3380_v30  ;;  %v3461_v30 = vld [vmem:[#allocation8 + $0x1cc] ss:$16 sps:$4 sm:$0xff]  }
  0x82   :  { %791 = vmatpush1.bf16.msra.mxu0 %v3378_v31  ;;  %v3456_v31 = vld [vmem:[#allocation8 + $0x1c0] ss:$16 sps:$4 sm:$0xff]  }
  0x83   :  { %792 = vmatprep.subr.bf16.mxu0 %v3386_v32  ;;  %v3459_v32 = vld [vmem:[#allocation8 + $0x1c8] ss:$16 sps:$4 sm:$0xff]  }
  0x86   :  { %793 = vmatpush1.bf16.msra.mxu0 %v3384_v33  ;;  %v3464_v33 = vld [vmem:[#allocation8 + $0x1e4] ss:$16 sps:$4 sm:$0xff]  }
  0x87   :  { %794 = vmatprep.subr.bf16.mxu0 %v3392_v34  ;;  %v3467_v34 = vld [vmem:[#allocation8 + $0x1ec] ss:$16 sps:$4 sm:$0xff]  }
  0x8a   :  { %795 = vmatpush1.bf16.msra.mxu0 %v3390_v35  ;;  %v3462_v35 = vld [vmem:[#allocation8 + $0x1e0] ss:$16 sps:$4 sm:$0xff]  }
  0x8b   :  { %796 = vmatprep.subr.bf16.mxu0 %v3398_v36  ;;  %v3465_v36 = vld [vmem:[#allocation8 + $0x1e8] ss:$16 sps:$4 sm:$0xff]  }
  0x8e   :  { %797 = vmatpush1.bf16.msra.mxu0 %v3396_v37  ;;  %v886_v37 = vld [vmem:[#allocation10] sm:$0xff] }
  0x8f   :  { %798 = vmatprep.subr.bf16.mxu0 %v3404_v38  ;;  %v890_v38 = vld [vmem:[#allocation10 + $0x20] sm:$0xff] }
  0x92   :  { %799 = vmatpush1.bf16.msra.mxu0 %v3402_v39  ;;  %v887_v39 = vld [vmem:[#allocation10 + $0x8] sm:$0xff] }
  0x93   :  { %800 = vmatprep.subr.bf16.mxu0 %v3410_v40  ;;  %v2989_v40 = vcombine.low %v886_v37, %v890_v38 }
  0x96   :  { %801 = vmatpush1.bf16.msra.mxu0 %v3408_v41  ;;  %v2990_v41 = vcombine.high %v886_v37, %v890_v38 }
  0x97   :  { %802 = vmatprep.subr.bf16.mxu0 %v3416_v42  ;;  %v891_v42 = vld [vmem:[#allocation10 + $0x28] sm:$0xff] }
  0x9a   :  { %803 = vmatpush1.bf16.msra.mxu0 %v3414_v43  ;;  %v2991_v43 = vcombine.low %v887_v39, %v891_v42 }
  0x9b   :  { %804 = vmatprep.subr.bf16.mxu0 %v3422_v44  ;;  %v2992_v44 = vcombine.high %v887_v39, %v891_v42  ;;  %v935_v42 = vld [vmem:[#allocation10 + $0x188] sm:$0xff] }
  0x9e   :  { %805 = vmatpush1.bf16.msra.mxu0 %v3420_v45  ;;  %v243_v45 = vlaneseq }
  0x9f   :  { %806 = vmatprep.subr.bf16.mxu0 %v3428_v46 }
  0xa0   :  { %v3793_v46 = vshrl.u32 %v243_v45, 7 }
  0xa2   :  { %807 = vmatpush1.bf16.msra.mxu0 %v3426_v47  ;;  %v3796_v47 = vsub.s32 0, %v3793_v46 }
  0xa3   :  { %808 = vmatprep.subr.bf16.mxu0 %v3434_v48  ;;  %v241_v48 = vld [vmem:[%s3873_s4] sm:$0x3] }
  0xa6   :  { %809 = vmatpush1.bf16.msra.mxu0 %v3432_v49  ;;  %v3802_v49 = vsub.s32 1, %v3793_v46 }
  0xa7   :  { %810 = vmatprep.subr.bf16.mxu0 %v3440_v50  ;;  %v246_v50 = vrot.slane %v241_v48, %v3796_v47 }
  0xaa   :  { %811 = vmatpush1.bf16.msra.mxu0 %v3438_v51  ;;  %v250_v51 = vrot.slane %v241_v48, %v3802_v49 }
  0xab   :  { %812 = vmatprep.subr.bf16.mxu0 %v3446_v52 }
  0xae   :  { %813 = vmatpush1.bf16.msra.mxu0 %v3444_v53 }
  0xaf   :  { %814 = vmatprep.subr.bf16.mxu0 %v3452_v54 }
  0xb2   :  { %815 = vmatpush1.bf16.msra.mxu0 %v3450_v55 }
  0xb3   :  { %816 = vmatprep.subr.bf16.mxu0 %v3458_v29 }
  0xb6   :  { %817 = vmatpush1.bf16.msra.mxu0 %v3456_v31 }
  0xb7   :  { %818 = vmatprep.subr.bf16.mxu0 %v3464_v33  ;;  %v930_v33 = vld [vmem:[#allocation10 + $0x160] sm:$0xff] }
  0xba   :  { %819 = vmatpush1.bf16.msra.mxu0 %v3462_v35  ;;  %v931_v35 = vld [vmem:[#allocation10 + $0x168] sm:$0xff] }
  0xbb   :  { %2464 = vmatprep.subr.bf16.mxu0 %v2990_v41  ;;  %v938_v41 = vld [vmem:[#allocation10 + $0x1a0] sm:$0xff] }
 0x150   :  { %v215_v57 = vpop.f32.mrb[0].mxu0 }
 0x151   :  { %v216_v58 = vadd.f32 %v2899_v56, %v215_v57  ;;  %v3288_v59 = vpop.f32.mrb[1].mxu0 }
 0x152   :  { %v218_v60 = vpop.f32.mrb[2].mxu0 }
 0x153   :  { %v219_v61 = vadd.f32 %v2899_v56, %v218_v60  ;;  %v3289_v62 = vpop.f32.mrb[3].mxu0  ;;  %v222_v63 = vmax.f32 %v216_v58, 0.0 }
 0x154   :  { %v894_v62 = vld [vmem:[#allocation10 + $0x40] sm:$0xff] }
 0x155   :  { %v223_v0 = vmax.f32 %v219_v61, 0.0 }
 0x157   :  { %v224_v2 = vpack.c.bf16 %v223_v0, %v222_v63 }
 0x159   :  { %366 = vmatmul.mubr.bf16.vlgmr.msra.gmra.mrb[0].mxu1 %v224_v2  ;;  %v895_v2 = vld [vmem:[#allocation10 + $0x48] sm:$0xff] }
 0x15a   :  { %832 = vmatpush1.bf16.msra.mxu1 %v3375_v1  ;;  %v898_v1 = vld [vmem:[#allocation10 + $0x60] sm:$0xff] }
 0x15b   :  { %833 = vmatprep.subr.bf16.mxu1 %v3383_v3  ;;  %v899_v3 = vld [vmem:[#allocation10 + $0x68] sm:$0xff] }
 0x15e   :  { %834 = vmatpush1.bf16.msra.mxu1 %v3381_v4 }
 0x15f   :  { %835 = vmatprep.subr.bf16.mxu1 %v3389_v5 }
 0x162   :  { %836 = vmatpush1.bf16.msra.mxu1 %v3387_v6  ;;  %v2998_v6 = vcombine.high %v894_v62, %v898_v1 }
 0x163   :  { %837 = vmatprep.subr.bf16.mxu1 %v3395_v7  ;;  %v3000_v7 = vcombine.high %v895_v2, %v899_v3 }
 0x166   :  { %838 = vmatpush1.bf16.msra.mxu1 %v3393_v8  ;;  %v902_v8 = vld [vmem:[#allocation10 + $0x80] sm:$0xff] }
 0x167   :  { %839 = vmatprep.subr.bf16.mxu1 %v3401_v9  ;;  %v906_v9 = vld [vmem:[#allocation10 + $0xa0] sm:$0xff] }
 0x16a   :  { %840 = vmatpush1.bf16.msra.mxu1 %v3399_v10  ;;  %v903_v10 = vld [vmem:[#allocation10 + $0x88] sm:$0xff] }
 0x16b   :  { %841 = vmatprep.subr.bf16.mxu1 %v3407_v11  ;;  %v907_v11 = vld [vmem:[#allocation10 + $0xa8] sm:$0xff] }
 0x16e   :  { %842 = vmatpush1.bf16.msra.mxu1 %v3405_v12  ;;  %v2997_v12 = vcombine.low %v894_v62, %v898_v1  ;;  %v955_v62 = vld [vmem:[#allocation10 + $0x228] sm:$0xff] }
 0x16f   :  { %843 = vmatprep.subr.bf16.mxu1 %v3413_v13  ;;  %v2999_v13 = vcombine.low %v895_v2, %v899_v3  ;;  %v958_v3 = vld [vmem:[#allocation10 + $0x240] sm:$0xff] }
 0x172   :  { %844 = vmatpush1.bf16.msra.mxu1 %v3411_v14  ;;  %v3006_v14 = vcombine.high %v902_v8, %v906_v9 }
 0x173   :  { %845 = vmatprep.subr.bf16.mxu1 %v3419_v15  ;;  %v3008_v15 = vcombine.high %v903_v10, %v907_v11 }
 0x176   :  { %846 = vmatpush1.bf16.msra.mxu1 %v3417_v16  ;;  %v910_v16 = vld [vmem:[#allocation10 + $0xc0] sm:$0xff] }
 0x177   :  { %847 = vmatprep.subr.bf16.mxu1 %v3425_v17  ;;  %v914_v17 = vld [vmem:[#allocation10 + $0xe0] sm:$0xff] }
 0x17a   :  { %848 = vmatpush1.bf16.msra.mxu1 %v3423_v18  ;;  %v911_v18 = vld [vmem:[#allocation10 + $0xc8] sm:$0xff] }
 0x17b   :  { %849 = vmatprep.subr.bf16.mxu1 %v3431_v19  ;;  %v915_v19 = vld [vmem:[#allocation10 + $0xe8] sm:$0xff] }
 0x17c   :  { %v3015_v29 = vcombine.low %v911_v18, %v915_v19 }
 0x17e   :  { %850 = vmatpush1.bf16.msra.mxu1 %v3429_v20  ;;  %v3005_v20 = vcombine.low %v902_v8, %v906_v9 }
 0x17f   :  { %851 = vmatprep.subr.bf16.mxu1 %v3437_v21  ;;  %v3007_v21 = vcombine.low %v903_v10, %v907_v11  ;;  %v966_v11 = vld [vmem:[#allocation10 + $0x280] sm:$0xff] }
 0x182   :  { %852 = vmatpush1.bf16.msra.mxu1 %v3435_v22  ;;  %v3014_v22 = vcombine.high %v910_v16, %v914_v17 }
 0x183   :  { %853 = vmatprep.subr.bf16.mxu1 %v3443_v23  ;;  %v3016_v23 = vcombine.high %v911_v18, %v915_v19  ;;  %v974_v19 = vld [vmem:[#allocation10 + $0x2c0] sm:$0xff] }
 0x186   :  { %854 = vmatpush1.bf16.msra.mxu1 %v3441_v24  ;;  %v918_v24 = vld [vmem:[#allocation10 + $0x100] sm:$0xff] }
 0x187   :  { %855 = vmatprep.subr.bf16.mxu1 %v3449_v25  ;;  %v922_v25 = vld [vmem:[#allocation10 + $0x120] sm:$0xff] }
 0x18a   :  { %856 = vmatpush1.bf16.msra.mxu1 %v3447_v26  ;;  %v919_v26 = vld [vmem:[#allocation10 + $0x108] sm:$0xff] }
 0x18b   :  { %857 = vmatprep.subr.bf16.mxu1 %v3455_v27  ;;  %v923_v27 = vld [vmem:[#allocation10 + $0x128] sm:$0xff] }
 0x18c   :  { %v3024_v31 = vcombine.high %v919_v26, %v923_v27  ;;  %v3023_v37 = vcombine.low %v919_v26, %v923_v27  ;;  %v982_v27 = vld [vmem:[#allocation10 + $0x300] sm:$0xff] }
 0x18e   :  { %858 = vmatpush1.bf16.msra.mxu1 %v3453_v28  ;;  %v3013_v28 = vcombine.low %v910_v16, %v914_v17 }
 0x18f   :  { %859 = vmatprep.subr.bf16.mxu1 %v3461_v30  ;;  %v3022_v30 = vcombine.high %v918_v24, %v922_v25 }
 0x192   :  { %860 = vmatpush1.bf16.msra.mxu1 %v3459_v32  ;;  %v926_v32 = vld [vmem:[#allocation10 + $0x140] sm:$0xff] }
 0x193   :  { %861 = vmatprep.subr.bf16.mxu1 %v3467_v34  ;;  %v927_v34 = vld [vmem:[#allocation10 + $0x148] sm:$0xff]  ;;  %v3030_v38 = vcombine.high %v926_v32, %v930_v33 }
 0x194   :  { %v3032_v39 = vcombine.high %v927_v34, %v931_v35  ;;  %v3031_v45 = vcombine.low %v927_v34, %v931_v35  ;;  %v990_v35 = vld [vmem:[#allocation10 + $0x340] sm:$0xff] }
 0x196   :  { %862 = vmatpush1.bf16.msra.mxu1 %v3465_v36  ;;  %v3021_v36 = vcombine.low %v918_v24, %v922_v25 }
 0x197   :  { %2550 = vmatprep.subr.bf16.mxu1 %v2992_v44  ;;  %v3029_v44 = vcombine.low %v926_v32, %v930_v33 }
 0x22c   :  { %v367_v52 = vpop.f32.mrb[0].mxu1 }
 0x22d   :  { %v368_v53 = vadd.f32 %v367_v52, %v246_v50  ;;  %v369_v54 = vpop.f32.mrb[1].mxu1  ;;  %v946_v52 = vld [vmem:[#allocation10 + $0x1e0] sm:$0xff] }
 0x22e   :  { %v370_v55 = vadd.f32 %v369_v54, %v250_v51  ;;  %v371_v56 = vpop.f32.mrb[2].mxu1  ;;  %v947_v54 = vld [vmem:[#allocation10 + $0x1e8] sm:$0xff] }
 0x22f   :  { %v372_v57 = vadd.f32 %v371_v56, %v246_v50  ;;  %v373_v58 = vpop.f32.mrb[3].mxu1  ;;  %v376_v60 = vmax.f32 %v368_v53, 0.0  ;;  %v943_v53 = vld [vmem:[#allocation10 + $0x1c8] sm:$0xff] }
 0x230   :  { %v374_v59 = vadd.f32 %v373_v58, %v250_v51  ;;  %v377_v63 = vmax.f32 %v370_v55, 0.0  ;;  %v942_v51 = vld [vmem:[#allocation10 + $0x1c0] sm:$0xff]  ;;  %v3048_v58 = vcombine.high %v943_v53, %v947_v54 }
 0x231   :  { %v378_v61 = vmax.f32 %v372_v57, 0.0  ;;  %v3046_v57 = vcombine.high %v942_v51, %v946_v52 }
 0x232   :  { %v379_v0 = vmax.f32 %v374_v59, 0.0  ;;  %v950_v59 = vld [vmem:[#allocation10 + $0x200] sm:$0xff] }
 0x233   :  { %v380_v4 = vpack.c.bf16 %v378_v61, %v376_v60  ;;  %v954_v60 = vld [vmem:[#allocation10 + $0x220] sm:$0xff]  ;;  %v951_v61 = vld [vmem:[#allocation10 + $0x208] sm:$0xff] }
 0x234   :  { %v381_v5 = vpack.c.bf16 %v379_v0, %v377_v63  ;;  %v3045_v63 = vcombine.low %v942_v51, %v946_v52  ;;  %v3047_v0 = vcombine.low %v943_v53, %v947_v54  ;;  %v3054_v1 = vcombine.high %v950_v59, %v954_v60  ;;  %v1003_v52 = vld [vmem:[#allocation10 + $0x3a8] sm:$0xff] }
 0x235   :  { %v3056_v2 = vcombine.high %v951_v61, %v955_v62  ;;  %v3055_v8 = vcombine.low %v951_v61, %v955_v62 }
 0x236   :  { %820 = vmatprep.mubr.bf16.mxu0 %v381_v5  ;;  %863 = vmatprep.mubr.bf16.mxu1 %v381_v5  ;;  %v959_v5 = vld [vmem:[#allocation10 + $0x248] sm:$0xff] }
 0x237   :  { %821 = vmatmul.mubr.bf16.vlgmr.msra.gmra.mrb[4].mxu0 %v380_v4  ;;  %864 = vmatmul.mubr.bf16.vlgmr.msra.gmra.mrb[4].mxu1 %v380_v4  ;;  %v962_v4 = vld [vmem:[#allocation10 + $0x260] sm:$0xff] }
 0x238   :  { %2465 = vmatpush1.bf16.msra.mxu0 %v2989_v40  ;;  %2551 = vmatpush1.bf16.msra.mxu1 %v2991_v43  ;;  %v934_v40 = vld [vmem:[#allocation10 + $0x180] sm:$0xff]  ;;  %v939_v43 = vld [vmem:[#allocation10 + $0x1a8] sm:$0xff]  ;;  %v3062_v9 = vcombine.high %v958_v3, %v962_v4 }
 0x239   :  { %2466 = vmatprep.subr.bf16.mxu0 %v2998_v6  ;;  %2552 = vmatprep.subr.bf16.mxu1 %v3000_v7  ;;  %v3038_v48 = vcombine.high %v934_v40, %v938_v41  ;;  %v3040_v50 = vcombine.high %v935_v42, %v939_v43  ;;  %v3037_v55 = vcombine.low %v934_v40, %v938_v41  ;;  %v963_v6 = vld [vmem:[#allocation10 + $0x268] sm:$0xff] }
 0x23a   :  { %v3039_v56 = vcombine.low %v935_v42, %v939_v43  ;;  %v3053_v7 = vcombine.low %v950_v59, %v954_v60  ;;  %v3064_v10 = vcombine.high %v959_v5, %v963_v6  ;;  %v3063_v16 = vcombine.low %v959_v5, %v963_v6  ;;  %v1011_v60 = vld [vmem:[#allocation10 + $0x3e8] sm:$0xff] }
 0x23c   :  { %2467 = vmatpush1.bf16.msra.mxu0 %v2997_v12  ;;  %2553 = vmatpush1.bf16.msra.mxu1 %v2999_v13  ;;  %v970_v12 = vld [vmem:[#allocation10 + $0x2a0] sm:$0xff]  ;;  %v967_v13 = vld [vmem:[#allocation10 + $0x288] sm:$0xff] }
 0x23d   :  { %2468 = vmatprep.subr.bf16.mxu0 %v3006_v14  ;;  %2554 = vmatprep.subr.bf16.mxu1 %v3008_v15  ;;  %v971_v14 = vld [vmem:[#allocation10 + $0x2a8] sm:$0xff]  ;;  %v3061_v15 = vcombine.low %v958_v3, %v962_v4  ;;  %v3070_v17 = vcombine.high %v966_v11, %v970_v12 }
 0x23e   :  { %v3072_v18 = vcombine.high %v967_v13, %v971_v14  ;;  %v3071_v24 = vcombine.low %v967_v13, %v971_v14  ;;  %v1019_v4 = vld [vmem:[#allocation10 + $0x428] sm:$0xff] }
 0x240   :  { %2469 = vmatpush1.bf16.msra.mxu0 %v3005_v20  ;;  %2555 = vmatpush1.bf16.msra.mxu1 %v3007_v21  ;;  %v978_v20 = vld [vmem:[#allocation10 + $0x2e0] sm:$0xff]  ;;  %v975_v21 = vld [vmem:[#allocation10 + $0x2c8] sm:$0xff] }
 0x241   :  { %2470 = vmatprep.subr.bf16.mxu0 %v3014_v22  ;;  %2556 = vmatprep.subr.bf16.mxu1 %v3016_v23  ;;  %v979_v22 = vld [vmem:[#allocation10 + $0x2e8] sm:$0xff]  ;;  %v3069_v23 = vcombine.low %v966_v11, %v970_v12  ;;  %v3078_v25 = vcombine.high %v974_v19, %v978_v20 }
 0x242   :  { %v3080_v26 = vcombine.high %v975_v21, %v979_v22  ;;  %v3079_v32 = vcombine.low %v975_v21, %v979_v22 }
 0x244   :  { %2471 = vmatpush1.bf16.msra.mxu0 %v3013_v28  ;;  %2557 = vmatpush1.bf16.msra.mxu1 %v3015_v29  ;;  %v986_v28 = vld [vmem:[#allocation10 + $0x320] sm:$0xff]  ;;  %v983_v29 = vld [vmem:[#allocation10 + $0x308] sm:$0xff] }
 0x245   :  { %2472 = vmatprep.subr.bf16.mxu0 %v3022_v30  ;;  %2558 = vmatprep.subr.bf16.mxu1 %v3024_v31  ;;  %v987_v30 = vld [vmem:[#allocation10 + $0x328] sm:$0xff]  ;;  %v3077_v31 = vcombine.low %v974_v19, %v978_v20  ;;  %v3086_v33 = vcombine.high %v982_v27, %v986_v28 }
 0x246   :  { %v3088_v34 = vcombine.high %v983_v29, %v987_v30  ;;  %v3087_v40 = vcombine.low %v983_v29, %v987_v30 }
 0x248   :  { %2473 = vmatpush1.bf16.msra.mxu0 %v3021_v36  ;;  %2559 = vmatpush1.bf16.msra.mxu1 %v3023_v37  ;;  %v994_v36 = vld [vmem:[#allocation10 + $0x360] sm:$0xff]  ;;  %v991_v37 = vld [vmem:[#allocation10 + $0x348] sm:$0xff] }
 0x249   :  { %2474 = vmatprep.subr.bf16.mxu0 %v3030_v38  ;;  %2560 = vmatprep.subr.bf16.mxu1 %v3032_v39  ;;  %v995_v38 = vld [vmem:[#allocation10 + $0x368] sm:$0xff]  ;;  %v3085_v39 = vcombine.low %v982_v27, %v986_v28  ;;  %v3094_v41 = vcombine.high %v990_v35, %v994_v36  ;;  %v3093_v43 = vcombine.low %v990_v35, %v994_v36 }
 0x24a   :  { %v3096_v42 = vcombine.high %v991_v37, %v995_v38 }
 0x24c   :  { %2475 = vmatpush1.bf16.msra.mxu0 %v3029_v44  ;;  %2561 = vmatpush1.bf16.msra.mxu1 %v3031_v45  ;;  %v3095_v44 = vcombine.low %v991_v37, %v995_v38  ;;  %v998_v45 = vld [vmem:[#allocation10 + $0x380] sm:$0xff] }
 0x24d   :  { %2476 = vmatprep.subr.bf16.mxu0 %v3038_v48  ;;  %2562 = vmatprep.subr.bf16.mxu1 %v3040_v50  ;;  %v1002_v48 = vld [vmem:[#allocation10 + $0x3a0] sm:$0xff]  ;;  %v999_v50 = vld [vmem:[#allocation10 + $0x388] sm:$0xff] }
 0x24e   :  { %v3102_v51 = vcombine.high %v998_v45, %v1002_v48  ;;  %v3101_v53 = vcombine.low %v998_v45, %v1002_v48  ;;  %v3103_v54 = vcombine.low %v999_v50, %v1003_v52 }
 0x250   :  { %2477 = vmatpush1.bf16.msra.mxu0 %v3037_v55  ;;  %2563 = vmatpush1.bf16.msra.mxu1 %v3039_v56  ;;  %v3104_v55 = vcombine.high %v999_v50, %v1003_v52  ;;  %v1006_v56 = vld [vmem:[#allocation10 + $0x3c0] sm:$0xff] }
 0x251   :  { %2478 = vmatprep.subr.bf16.mxu0 %v3046_v57  ;;  %2564 = vmatprep.subr.bf16.mxu1 %v3048_v58  ;;  %v1010_v57 = vld [vmem:[#allocation10 + $0x3e0] sm:$0xff]  ;;  %v1007_v58 = vld [vmem:[#allocation10 + $0x3c8] sm:$0xff] }
 0x252   :  { %v3110_v59 = vcombine.high %v1006_v56, %v1010_v57  ;;  %v3109_v61 = vcombine.low %v1006_v56, %v1010_v57  ;;  %v3111_v62 = vcombine.low %v1007_v58, %v1011_v60  ;;  %v1030_v50 = vld [vmem:[#allocation10 + $0x480] sm:$0xff] }
 0x254   :  { %2479 = vmatpush1.bf16.msra.mxu0 %v3045_v63  ;;  %2565 = vmatpush1.bf16.msra.mxu1 %v3047_v0  ;;  %v3112_v63 = vcombine.high %v1007_v58, %v1011_v60  ;;  %v1014_v0 = vld [vmem:[#allocation10 + $0x400] sm:$0xff] }
 0x255   :  { %2480 = vmatprep.subr.bf16.mxu0 %v3054_v1  ;;  %2566 = vmatprep.subr.bf16.mxu1 %v3056_v2  ;;  %v1018_v1 = vld [vmem:[#allocation10 + $0x420] sm:$0xff]  ;;  %v1015_v2 = vld [vmem:[#allocation10 + $0x408] sm:$0xff] }
 0x256   :  { %v3118_v3 = vcombine.high %v1014_v0, %v1018_v1  ;;  %v3117_v5 = vcombine.low %v1014_v0, %v1018_v1  ;;  %v3119_v6 = vcombine.low %v1015_v2, %v1019_v4  ;;  %v1038_v60 = vld [vmem:[#allocation10 + $0x4c0] sm:$0xff] }
 0x258   :  { %2481 = vmatpush1.bf16.msra.mxu0 %v3053_v7  ;;  %2567 = vmatpush1.bf16.msra.mxu1 %v3055_v8  ;;  %v3120_v7 = vcombine.high %v1015_v2, %v1019_v4  ;;  %v458_v8 = vsub.s32 2, %v3793_v46  ;;  %v1046_v4 = vld [vmem:[#allocation10 + $0x500] sm:$0xff] }
 0x259   :  { %2482 = vmatprep.subr.bf16.mxu0 %v3062_v9  ;;  %2568 = vmatprep.subr.bf16.mxu1 %v3064_v10  ;;  %v446_v9 = vld [vmem:[%s3875_s6] sm:$0xf]  ;;  %v462_v10 = vsub.s32 3, %v3793_v46 }
 0x25a   :  { %v451_v11 = vrot.slane %v446_v9, %v3796_v47  ;;  %v459_v12 = vrot.slane %v446_v9, %v458_v8  ;;  %v455_v13 = vrot.slane %v446_v9, %v3802_v49 }
 0x25b   :  { %v463_v14 = vrot.slane %v446_v9, %v462_v10 }
 0x25c   :  { %2483 = vmatpush1.bf16.msra.mxu0 %v3061_v15  ;;  %2569 = vmatpush1.bf16.msra.mxu1 %v3063_v16 }
 0x25d   :  { %2484 = vmatprep.subr.bf16.mxu0 %v3070_v17  ;;  %2570 = vmatprep.subr.bf16.mxu1 %v3072_v18 }
 0x260   :  { %2485 = vmatpush1.bf16.msra.mxu0 %v3069_v23  ;;  %2571 = vmatpush1.bf16.msra.mxu1 %v3071_v24 }
 0x261   :  { %2486 = vmatprep.subr.bf16.mxu0 %v3078_v25  ;;  %2572 = vmatprep.subr.bf16.mxu1 %v3080_v26 }
 0x264   :  { %2487 = vmatpush1.bf16.msra.mxu0 %v3077_v31  ;;  %2573 = vmatpush1.bf16.msra.mxu1 %v3079_v32 }
 0x265   :  { %2488 = vmatprep.subr.bf16.mxu0 %v3086_v33  ;;  %2574 = vmatprep.subr.bf16.mxu1 %v3088_v34 }
 0x268   :  { %2489 = vmatpush1.bf16.msra.mxu0 %v3085_v39  ;;  %2575 = vmatpush1.bf16.msra.mxu1 %v3087_v40  ;;  %v1022_v39 = vld [vmem:[#allocation10 + $0x440] sm:$0xff] }
 0x269   :  { %2490 = vmatprep.subr.bf16.mxu0 %v3094_v41  ;;  %2576 = vmatprep.subr.bf16.mxu1 %v3096_v42  ;;  %v1026_v42 = vld [vmem:[#allocation10 + $0x460] sm:$0xff] }
 0x26a   :  { %v3125_v56 = vcombine.low %v1022_v39, %v1026_v42 }
 0x26c   :  { %2491 = vmatpush1.bf16.msra.mxu0 %v3093_v43  ;;  %2577 = vmatpush1.bf16.msra.mxu1 %v3095_v44  ;;  %v1023_v43 = vld [vmem:[#allocation10 + $0x448] sm:$0xff] }
 0x26d   :  { %2492 = vmatprep.subr.bf16.mxu0 %v3102_v51  ;;  %2578 = vmatprep.subr.bf16.mxu1 %v3104_v55  ;;  %v1027_v44 = vld [vmem:[#allocation10 + $0x468] sm:$0xff]  ;;  %v3126_v51 = vcombine.high %v1022_v39, %v1026_v42  ;;  %v1082_v39 = vld [vmem:[#allocation10 + $0x620] sm:$0xff] }
 0x26e   :  { %v3128_v52 = vcombine.high %v1023_v43, %v1027_v44  ;;  %v1035_v55 = vld [vmem:[#allocation10 + $0x4a8] sm:$0xff]  ;;  %v3127_v57 = vcombine.low %v1023_v43, %v1027_v44 }
 0x26f   :  { %v1079_v42 = vld [vmem:[#allocation10 + $0x608] sm:$0xff] }
 0x270   :  { %2493 = vmatpush1.bf16.msra.mxu0 %v3101_v53  ;;  %2579 = vmatpush1.bf16.msra.mxu1 %v3103_v54  ;;  %v1034_v53 = vld [vmem:[#allocation10 + $0x4a0] sm:$0xff]  ;;  %v1031_v54 = vld [vmem:[#allocation10 + $0x488] sm:$0xff] }
 0x271   :  { %2494 = vmatprep.subr.bf16.mxu0 %v3110_v59  ;;  %2580 = vmatprep.subr.bf16.mxu1 %v3112_v63  ;;  %v3134_v58 = vcombine.high %v1030_v50, %v1034_v53  ;;  %v3136_v59 = vcombine.high %v1031_v54, %v1035_v55  ;;  %v1043_v63 = vld [vmem:[#allocation10 + $0x4e8] sm:$0xff]  ;;  %v3133_v0 = vcombine.low %v1030_v50, %v1034_v53  ;;  %v1086_v53 = vld [vmem:[#allocation10 + $0x640] sm:$0xff] }
 0x272   :  { %v3135_v1 = vcombine.low %v1031_v54, %v1035_v55  ;;  %v1083_v43 = vld [vmem:[#allocation10 + $0x628] sm:$0xff]  ;;  %v1090_v54 = vld [vmem:[#allocation10 + $0x660] sm:$0xff] }
 0x273   :  { %v1087_v55 = vld [vmem:[#allocation10 + $0x648] sm:$0xff] }
 0x274   :  { %2495 = vmatpush1.bf16.msra.mxu0 %v3109_v61  ;;  %2581 = vmatpush1.bf16.msra.mxu1 %v3111_v62  ;;  %v1042_v61 = vld [vmem:[#allocation10 + $0x4e0] sm:$0xff]  ;;  %v1039_v62 = vld [vmem:[#allocation10 + $0x4c8] sm:$0xff] }
 0x275   :  { %2507 = vmatprep.subr.bf16.mxu0 %v3118_v3  ;;  %2593 = vmatprep.subr.bf16.mxu1 %v3120_v7  ;;  %v3142_v2 = vcombine.high %v1038_v60, %v1042_v61  ;;  %v3144_v3 = vcombine.high %v1039_v62, %v1043_v63  ;;  %v1051_v7 = vld [vmem:[#allocation10 + $0x528] sm:$0xff]  ;;  %v3141_v9 = vcombine.low %v1038_v60, %v1042_v61  ;;  %v1094_v61 = vld [vmem:[#allocation10 + $0x680] sm:$0xff] }
 0x30a   :  { %v822_v15 = vpop.f32.mrb[4].mxu0  ;;  %v865_v16 = vpop.f32.mrb[4].mxu1 }
 0x30b   :  { %v823_v17 = vadd.f32 %v822_v15, %v451_v11  ;;  %v866_v18 = vadd.f32 %v865_v16, %v459_v12  ;;  %v824_v19 = vpop.f32.mrb[5].mxu0  ;;  %v867_v20 = vpop.f32.mrb[5].mxu1  ;;  %v1058_v15 = vld [vmem:[#allocation10 + $0x560] sm:$0xff]  ;;  %v1055_v16 = vld [vmem:[#allocation10 + $0x548] sm:$0xff] }
 0x30c   :  { %v825_v21 = vadd.f32 %v824_v19, %v455_v13  ;;  %v868_v22 = vadd.f32 %v867_v20, %v463_v14  ;;  %v826_v23 = vpop.f32.mrb[6].mxu0  ;;  %v869_v24 = vpop.f32.mrb[6].mxu1 }
 0x30d   :  { %v827_v25 = vadd.f32 %v826_v23, %v451_v11  ;;  %v870_v26 = vadd.f32 %v869_v24, %v459_v12  ;;  %v828_v27 = vpop.f32.mrb[7].mxu0  ;;  %v871_v28 = vpop.f32.mrb[7].mxu1  ;;  %v874_v31 = vmax.f32 %v823_v17, 0.0  ;;  %v876_v32 = vmax.f32 %v866_v18, 0.0  ;;  %v1059_v17 = vld [vmem:[#allocation10 + $0x568] sm:$0xff]  ;;  %v1066_v23 = vld [vmem:[#allocation10 + $0x5a0] sm:$0xff] }
 0x30e   :  { %v829_v29 = vadd.f32 %v828_v27, %v455_v13  ;;  %v872_v30 = vadd.f32 %v871_v28, %v463_v14  ;;  %v875_v35 = vmax.f32 %v825_v21, 0.0  ;;  %v877_v36 = vmax.f32 %v868_v22, 0.0  ;;  %v1054_v14 = vld [vmem:[#allocation10 + $0x540] sm:$0xff]  ;;  %v1063_v24 = vld [vmem:[#allocation10 + $0x588] sm:$0xff] }
 0x30f   :  { %v878_v33 = vmax.f32 %v827_v25, 0.0  ;;  %v880_v34 = vmax.f32 %v870_v26, 0.0  ;;  %v3143_v11 = vcombine.low %v1039_v62, %v1043_v63  ;;  %v3158_v20 = vcombine.high %v1054_v14, %v1058_v15  ;;  %v1062_v22 = vld [vmem:[#allocation10 + $0x580] sm:$0xff]  ;;  %v1067_v25 = vld [vmem:[#allocation10 + $0x5a8] sm:$0xff] }
 0x310   :  { %v879_v37 = vmax.f32 %v829_v29, 0.0  ;;  %v881_v38 = vmax.f32 %v872_v30, 0.0  ;;  %v3160_v21 = vcombine.high %v1055_v16, %v1059_v17  ;;  %v3157_v26 = vcombine.low %v1054_v14, %v1058_v15  ;;  %v1070_v30 = vld [vmem:[#allocation10 + $0x5c0] sm:$0xff]  ;;  %v1095_v63 = vld [vmem:[#allocation10 + $0x688] sm:$0xff] }
 0x311   :  { %v3817_v40 = vpack.c.bf16 %v878_v33, %v874_v31  ;;  %v3819_v41 = vpack.c.bf16 %v880_v34, %v876_v32  ;;  %v3159_v27 = vcombine.low %v1055_v16, %v1059_v17  ;;  %v3166_v28 = vcombine.high %v1062_v22, %v1066_v23  ;;  %v1074_v31 = vld [vmem:[#allocation10 + $0x5e0] sm:$0xff]  ;;  %v1071_v32 = vld [vmem:[#allocation10 + $0x5c8] sm:$0xff] }
 0x312   :  { %v3821_v45 = vpack.c.bf16 %v879_v37, %v875_v35  ;;  %v3823_v48 = vpack.c.bf16 %v881_v38, %v877_v36  ;;  %v3168_v29 = vcombine.high %v1063_v24, %v1067_v25  ;;  %v1075_v33 = vld [vmem:[#allocation10 + $0x5e8] sm:$0xff]  ;;  %v3165_v34 = vcombine.low %v1062_v22, %v1066_v23  ;;  %v1078_v38 = vld [vmem:[#allocation10 + $0x600] sm:$0xff] }
 0x313   :  { %v3167_v35 = vcombine.low %v1063_v24, %v1067_v25  ;;  %v3174_v36 = vcombine.high %v1070_v30, %v1074_v31  ;;  %v3176_v37 = vcombine.high %v1071_v32, %v1075_v33  ;;  %v3173_v44 = vcombine.low %v1070_v30, %v1074_v31  ;;  %v1098_v62 = vld [vmem:[#allocation10 + $0x6a0] sm:$0xff]  ;;  %v1111_v17 = vld [vmem:[#allocation10 + $0x708] sm:$0xff] }
 0x314   :  { %2496 = vmatprep.mubr.bf16.mxu0 %v3821_v45  ;;  %2582 = vmatprep.mubr.bf16.mxu1 %v3821_v45  ;;  %v3175_v50 = vcombine.low %v1071_v32, %v1075_v33  ;;  %v1110_v15 = vld [vmem:[#allocation10 + $0x700] sm:$0xff]  ;;  %v1119_v25 = vld [vmem:[#allocation10 + $0x748] sm:$0xff] }
 0x315   :  { %2497 = vmatmul.mubr.bf16.vlgmr.msra.gmra.mrb[8].mxu0 %v3817_v40  ;;  %2583 = vmatmul.mubr.bf16.vlgmr.msra.gmra.mrb[8].mxu1 %v3817_v40  ;;  %v1114_v16 = vld [vmem:[#allocation10 + $0x720] sm:$0xff]  ;;  %v1127_v33 = vld [vmem:[#allocation10 + $0x788] sm:$0xff] }
 0x316   :  { %2508 = vmatpush1.bf16.msra.mxu0 %v3117_v5  ;;  %2594 = vmatpush1.bf16.msra.mxu1 %v3119_v6  ;;  %v1050_v5 = vld [vmem:[#allocation10 + $0x520] sm:$0xff]  ;;  %v1047_v6 = vld [vmem:[#allocation10 + $0x508] sm:$0xff] }
 0x317   :  { %2539 = vmatprep.mubr.bf16.mxu0 %v3823_v48  ;;  %2625 = vmatprep.mubr.bf16.mxu1 %v3823_v48  ;;  %v3150_v12 = vcombine.high %v1046_v4, %v1050_v5  ;;  %v3152_v13 = vcombine.high %v1047_v6, %v1051_v7  ;;  %v3149_v18 = vcombine.low %v1046_v4, %v1050_v5  ;;  %v1102_v5 = vld [vmem:[#allocation10 + $0x6c0] sm:$0xff] }
 0x318   :  { %2509 = vmatprep.subr.bf16.mxu0 %v3126_v51  ;;  %2595 = vmatprep.subr.bf16.mxu1 %v3128_v52  ;;  %v3151_v19 = vcombine.low %v1047_v6, %v1051_v7  ;;  %v3182_v51 = vcombine.high %v1078_v38, %v1082_v39  ;;  %v3184_v52 = vcombine.high %v1079_v42, %v1083_v43  ;;  %v1106_v6 = vld [vmem:[#allocation10 + $0x6e0] sm:$0xff]  ;;  %v1103_v7 = vld [vmem:[#allocation10 + $0x6c8] sm:$0xff] }
 0x319   :  { %v1118_v23 = vld [vmem:[#allocation10 + $0x740] sm:$0xff] }
 0x31a   :  { %2510 = vmatpush1.bf16.msra.mxu0 %v3125_v56  ;;  %2596 = vmatpush1.bf16.msra.mxu1 %v3127_v57  ;;  %v1091_v56 = vld [vmem:[#allocation10 + $0x668] sm:$0xff]  ;;  %v3181_v57 = vcombine.low %v1078_v38, %v1082_v39  ;;  %v1122_v24 = vld [vmem:[#allocation10 + $0x760] sm:$0xff] }
 0x31b   :  { %2511 = vmatprep.subr.bf16.mxu0 %v3134_v58  ;;  %2597 = vmatprep.subr.bf16.mxu1 %v3136_v59  ;;  %v3183_v58 = vcombine.low %v1079_v42, %v1083_v43  ;;  %v3190_v59 = vcombine.high %v1086_v53, %v1090_v54  ;;  %v3192_v60 = vcombine.high %v1087_v55, %v1091_v56  ;;  %v1126_v31 = vld [vmem:[#allocation10 + $0x780] sm:$0xff]  ;;  %v1135_v43 = vld [vmem:[#allocation10 + $0x7c8] sm:$0xff] }
 0x31c   :  { %v1130_v32 = vld [vmem:[#allocation10 + $0x7a0] sm:$0xff] }
 0x31d   :  { %v1134_v39 = vld [vmem:[#allocation10 + $0x7c0] sm:$0xff] }
 0x31e   :  { %2512 = vmatpush1.bf16.msra.mxu0 %v3133_v0  ;;  %2598 = vmatpush1.bf16.msra.mxu1 %v3135_v1  ;;  %v1099_v0 = vld [vmem:[#allocation10 + $0x6a8] sm:$0xff]  ;;  %v3189_v1 = vcombine.low %v1086_v53, %v1090_v54  ;;  %v1138_v42 = vld [vmem:[#allocation10 + $0x7e0] sm:$0xff]  ;;  %v888_v54 = vld [vmem:[#allocation10 + $0x10] sm:$0xff] }
 0x31f   :  { %2513 = vmatprep.subr.bf16.mxu0 %v3142_v2  ;;  %2599 = vmatprep.subr.bf16.mxu1 %v3144_v3  ;;  %v3191_v2 = vcombine.low %v1087_v55, %v1091_v56  ;;  %v3198_v3 = vcombine.high %v1094_v61, %v1098_v62  ;;  %v3200_v4 = vcombine.high %v1095_v63, %v1099_v0  ;;  %v892_v55 = vld [vmem:[#allocation10 + $0x30] sm:$0xff]  ;;  %v889_v56 = vld [vmem:[#allocation10 + $0x18] sm:$0xff] }
 0x322   :  { %2514 = vmatpush1.bf16.msra.mxu0 %v3141_v9  ;;  %2600 = vmatpush1.bf16.msra.mxu1 %v3143_v11  ;;  %v1107_v9 = vld [vmem:[#allocation10 + $0x6e8] sm:$0xff]  ;;  %v3197_v11 = vcombine.low %v1094_v61, %v1098_v62  ;;  %v896_v62 = vld [vmem:[#allocation10 + $0x50] sm:$0xff] }
 0x323   :  { %2515 = vmatprep.subr.bf16.mxu0 %v3150_v12  ;;  %2601 = vmatprep.subr.bf16.mxu1 %v3152_v13  ;;  %v3199_v12 = vcombine.low %v1095_v63, %v1099_v0  ;;  %v3206_v13 = vcombine.high %v1102_v5, %v1106_v6  ;;  %v3208_v14 = vcombine.high %v1103_v7, %v1107_v9  ;;  %v900_v63 = vld [vmem:[#allocation10 + $0x70] sm:$0xff]  ;;  %v897_v0 = vld [vmem:[#allocation10 + $0x58] sm:$0xff] }
 0x326   :  { %2516 = vmatpush1.bf16.msra.mxu0 %v3149_v18  ;;  %2602 = vmatpush1.bf16.msra.mxu1 %v3151_v19  ;;  %v1115_v18 = vld [vmem:[#allocation10 + $0x728] sm:$0xff]  ;;  %v3205_v19 = vcombine.low %v1102_v5, %v1106_v6  ;;  %v904_v6 = vld [vmem:[#allocation10 + $0x90] sm:$0xff] }
 0x327   :  { %2517 = vmatprep.subr.bf16.mxu0 %v3158_v20  ;;  %2603 = vmatprep.subr.bf16.mxu1 %v3160_v21  ;;  %v3207_v20 = vcombine.low %v1103_v7, %v1107_v9  ;;  %v3214_v21 = vcombine.high %v1110_v15, %v1114_v16  ;;  %v3216_v22 = vcombine.high %v1111_v17, %v1115_v18  ;;  %v908_v7 = vld [vmem:[#allocation10 + $0xb0] sm:$0xff]  ;;  %v905_v9 = vld [vmem:[#allocation10 + $0x98] sm:$0xff] }
 0x32a   :  { %2518 = vmatpush1.bf16.msra.mxu0 %v3157_v26  ;;  %2604 = vmatpush1.bf16.msra.mxu1 %v3159_v27  ;;  %v1123_v26 = vld [vmem:[#allocation10 + $0x768] sm:$0xff]  ;;  %v3213_v27 = vcombine.low %v1110_v15, %v1114_v16  ;;  %v912_v16 = vld [vmem:[#allocation10 + $0xd0] sm:$0xff] }
 0x32b   :  { %2519 = vmatprep.subr.bf16.mxu0 %v3166_v28  ;;  %2605 = vmatprep.subr.bf16.mxu1 %v3168_v29  ;;  %v3215_v28 = vcombine.low %v1111_v17, %v1115_v18  ;;  %v3222_v29 = vcombine.high %v1118_v23, %v1122_v24  ;;  %v3224_v30 = vcombine.high %v1119_v25, %v1123_v26  ;;  %v916_v17 = vld [vmem:[#allocation10 + $0xf0] sm:$0xff]  ;;  %v913_v18 = vld [vmem:[#allocation10 + $0xd8] sm:$0xff] }
 0x32e   :  { %2520 = vmatpush1.bf16.msra.mxu0 %v3165_v34  ;;  %2606 = vmatpush1.bf16.msra.mxu1 %v3167_v35  ;;  %v1131_v34 = vld [vmem:[#allocation10 + $0x7a8] sm:$0xff]  ;;  %v3221_v35 = vcombine.low %v1118_v23, %v1122_v24  ;;  %v920_v24 = vld [vmem:[#allocation10 + $0x110] sm:$0xff] }
 0x32f   :  { %2521 = vmatprep.subr.bf16.mxu0 %v3174_v36  ;;  %2607 = vmatprep.subr.bf16.mxu1 %v3176_v37  ;;  %v3223_v36 = vcombine.low %v1119_v25, %v1123_v26  ;;  %v3230_v37 = vcombine.high %v1126_v31, %v1130_v32  ;;  %v3232_v38 = vcombine.high %v1127_v33, %v1131_v34  ;;  %v924_v25 = vld [vmem:[#allocation10 + $0x130] sm:$0xff]  ;;  %v925_v26 = vld [vmem:[#allocation10 + $0x138] sm:$0xff] }
 0x332   :  { %2522 = vmatpush1.bf16.msra.mxu0 %v3173_v44  ;;  %2608 = vmatpush1.bf16.msra.mxu1 %v3175_v50  ;;  %v1139_v44 = vld [vmem:[#allocation10 + $0x7e8] sm:$0xff]  ;;  %v3229_v50 = vcombine.low %v1126_v31, %v1130_v32  ;;  %v928_v31 = vld [vmem:[#allocation10 + $0x150] sm:$0xff] }
 0x333   :  { %2523 = vmatprep.subr.bf16.mxu0 %v3182_v51  ;;  %2609 = vmatprep.subr.bf16.mxu1 %v3184_v52  ;;  %v3231_v51 = vcombine.low %v1127_v33, %v1131_v34  ;;  %v3238_v52 = vcombine.high %v1134_v39, %v1138_v42  ;;  %v3240_v53 = vcombine.high %v1135_v43, %v1139_v44  ;;  %v932_v32 = vld [vmem:[#allocation10 + $0x170] sm:$0xff]  ;;  %v929_v33 = vld [vmem:[#allocation10 + $0x158] sm:$0xff] }
 0x334   :  { %v933_v34 = vld [vmem:[#allocation10 + $0x178] sm:$0xff] }
 0x336   :  { %2524 = vmatpush1.bf16.msra.mxu0 %v3181_v57  ;;  %2610 = vmatpush1.bf16.msra.mxu1 %v3183_v58  ;;  %v893_v57 = vld [vmem:[#allocation10 + $0x38] sm:$0xff]  ;;  %v3237_v58 = vcombine.low %v1134_v39, %v1138_v42  ;;  %v936_v39 = vld [vmem:[#allocation10 + $0x190] sm:$0xff] }
 0x337   :  { %2525 = vmatprep.subr.bf16.mxu0 %v3190_v59  ;;  %2611 = vmatprep.subr.bf16.mxu1 %v3192_v60  ;;  %v3239_v59 = vcombine.low %v1135_v43, %v1139_v44  ;;  %v2994_v60 = vcombine.high %v888_v54, %v892_v55  ;;  %v2996_v61 = vcombine.high %v889_v56, %v893_v57  ;;  %v940_v42 = vld [vmem:[#allocation10 + $0x1b0] sm:$0xff]  ;;  %v937_v43 = vld [vmem:[#allocation10 + $0x198] sm:$0xff] }
 0x338   :  { %v941_v44 = vld [vmem:[#allocation10 + $0x1b8] sm:$0xff] }
 0x33a   :  { %2526 = vmatpush1.bf16.msra.mxu0 %v3189_v1  ;;  %2612 = vmatpush1.bf16.msra.mxu1 %v3191_v2  ;;  %v901_v1 = vld [vmem:[#allocation10 + $0x78] sm:$0xff]  ;;  %v2993_v2 = vcombine.low %v888_v54, %v892_v55  ;;  %v944_v54 = vld [vmem:[#allocation10 + $0x1d0] sm:$0xff] }
 0x33b   :  { %2527 = vmatprep.subr.bf16.mxu0 %v3198_v3  ;;  %2613 = vmatprep.subr.bf16.mxu1 %v3200_v4  ;;  %v2995_v3 = vcombine.low %v889_v56, %v893_v57  ;;  %v3002_v4 = vcombine.high %v896_v62, %v900_v63  ;;  %v3004_v5 = vcombine.high %v897_v0, %v901_v1  ;;  %v948_v55 = vld [vmem:[#allocation10 + $0x1f0] sm:$0xff]  ;;  %v945_v56 = vld [vmem:[#allocation10 + $0x1d8] sm:$0xff] }
 0x33c   :  { %v949_v57 = vld [vmem:[#allocation10 + $0x1f8] sm:$0xff] }
 0x33e   :  { %2528 = vmatpush1.bf16.msra.mxu0 %v3197_v11  ;;  %2614 = vmatpush1.bf16.msra.mxu1 %v3199_v12  ;;  %v909_v11 = vld [vmem:[#allocation10 + $0xb8] sm:$0xff]  ;;  %v3001_v12 = vcombine.low %v896_v62, %v900_v63  ;;  %v952_v62 = vld [vmem:[#allocation10 + $0x210] sm:$0xff] }
 0x33f   :  { %2529 = vmatprep.subr.bf16.mxu0 %v3206_v13  ;;  %2615 = vmatprep.subr.bf16.mxu1 %v3208_v14  ;;  %v3003_v13 = vcombine.low %v897_v0, %v901_v1  ;;  %v3010_v14 = vcombine.high %v904_v6, %v908_v7  ;;  %v3012_v15 = vcombine.high %v905_v9, %v909_v11  ;;  %v956_v63 = vld [vmem:[#allocation10 + $0x230] sm:$0xff]  ;;  %v953_v0 = vld [vmem:[#allocation10 + $0x218] sm:$0xff] }
 0x340   :  { %v957_v1 = vld [vmem:[#allocation10 + $0x238] sm:$0xff] }
 0x342   :  { %2530 = vmatpush1.bf16.msra.mxu0 %v3205_v19  ;;  %2616 = vmatpush1.bf16.msra.mxu1 %v3207_v20  ;;  %v917_v19 = vld [vmem:[#allocation10 + $0xf8] sm:$0xff]  ;;  %v3009_v20 = vcombine.low %v904_v6, %v908_v7  ;;  %v960_v6 = vld [vmem:[#allocation10 + $0x250] sm:$0xff] }
 0x343   :  { %2531 = vmatprep.subr.bf16.mxu0 %v3214_v21  ;;  %2617 = vmatprep.subr.bf16.mxu1 %v3216_v22  ;;  %v3011_v21 = vcombine.low %v905_v9, %v909_v11  ;;  %v3018_v22 = vcombine.high %v912_v16, %v916_v17  ;;  %v3020_v23 = vcombine.high %v913_v18, %v917_v19  ;;  %v964_v7 = vld [vmem:[#allocation10 + $0x270] sm:$0xff]  ;;  %v961_v9 = vld [vmem:[#allocation10 + $0x258] sm:$0xff] }
 0x344   :  { %v965_v11 = vld [vmem:[#allocation10 + $0x278] sm:$0xff] }
 0x346   :  { %2532 = vmatpush1.bf16.msra.mxu0 %v3213_v27  ;;  %2618 = vmatpush1.bf16.msra.mxu1 %v3215_v28  ;;  %v3017_v27 = vcombine.low %v912_v16, %v916_v17  ;;  %v3019_v28 = vcombine.low %v913_v18, %v917_v19  ;;  %v968_v16 = vld [vmem:[#allocation10 + $0x290] sm:$0xff]  ;;  %v969_v18 = vld [vmem:[#allocation10 + $0x298] sm:$0xff] }
 0x347   :  { %2533 = vmatprep.subr.bf16.mxu0 %v3222_v29  ;;  %2619 = vmatprep.subr.bf16.mxu1 %v3224_v30  ;;  %v3026_v29 = vcombine.high %v920_v24, %v924_v25  ;;  %v972_v17 = vld [vmem:[#allocation10 + $0x2b0] sm:$0xff]  ;;  %v973_v19 = vld [vmem:[#allocation10 + $0x2b8] sm:$0xff] }
 0x34a   :  { %2534 = vmatpush1.bf16.msra.mxu0 %v3221_v35  ;;  %2620 = vmatpush1.bf16.msra.mxu1 %v3223_v36  ;;  %v3025_v35 = vcombine.low %v920_v24, %v924_v25  ;;  %v976_v24 = vld [vmem:[#allocation10 + $0x2d0] sm:$0xff] }
 0x34b   :  { %2535 = vmatprep.subr.bf16.mxu0 %v3230_v37  ;;  %2621 = vmatprep.subr.bf16.mxu1 %v3232_v38  ;;  %v3034_v37 = vcombine.high %v928_v31, %v932_v32  ;;  %v3036_v38 = vcombine.high %v929_v33, %v933_v34  ;;  %v980_v25 = vld [vmem:[#allocation10 + $0x2f0] sm:$0xff] }
 0x34e   :  { %2536 = vmatpush1.bf16.msra.mxu0 %v3229_v50  ;;  %2622 = vmatpush1.bf16.msra.mxu1 %v3231_v51  ;;  %v3033_v50 = vcombine.low %v928_v31, %v932_v32  ;;  %v3035_v51 = vcombine.low %v929_v33, %v933_v34  ;;  %v984_v31 = vld [vmem:[#allocation10 + $0x310] sm:$0xff]  ;;  %v985_v33 = vld [vmem:[#allocation10 + $0x318] sm:$0xff] }
 0x34f   :  { %2537 = vmatprep.subr.bf16.mxu0 %v3238_v52  ;;  %2623 = vmatprep.subr.bf16.mxu1 %v3240_v53  ;;  %v3042_v52 = vcombine.high %v936_v39, %v940_v42  ;;  %v3044_v53 = vcombine.high %v937_v43, %v941_v44  ;;  %v988_v32 = vld [vmem:[#allocation10 + $0x330] sm:$0xff]  ;;  %v989_v34 = vld [vmem:[#allocation10 + $0x338] sm:$0xff] }
 0x352   :  { %2538 = vmatpush1.bf16.msra.mxu0 %v3237_v58  ;;  %2624 = vmatpush1.bf16.msra.mxu1 %v3239_v59  ;;  %v3041_v58 = vcombine.low %v936_v39, %v940_v42  ;;  %v3043_v59 = vcombine.low %v937_v43, %v941_v44  ;;  %v992_v39 = vld [vmem:[#allocation10 + $0x350] sm:$0xff]  ;;  %v993_v43 = vld [vmem:[#allocation10 + $0x358] sm:$0xff] }
 0x353   :  { %2636 = vmatprep.subr.bf16.mxu0 %v2994_v60  ;;  %2722 = vmatprep.subr.bf16.mxu1 %v2996_v61  ;;  %v3050_v60 = vcombine.high %v944_v54, %v948_v55  ;;  %v3052_v61 = vcombine.high %v945_v56, %v949_v57  ;;  %v996_v42 = vld [vmem:[#allocation10 + $0x370] sm:$0xff]  ;;  %v997_v44 = vld [vmem:[#allocation10 + $0x378] sm:$0xff] }
 0x355   :  { %2540 = vmatmul.mubr.bf16.vlgmr.msra.gmra.mrb[8].mxu0 %v3819_v41  ;;  %2626 = vmatmul.mubr.bf16.vlgmr.msra.gmra.mrb[8].mxu1 %v3819_v41 }
 0x356   :  { %2637 = vmatpush1.bf16.msra.mxu0 %v2993_v2  ;;  %2668 = vmatprep.mubr.bf16.mxu0 %v3821_v45  ;;  %v3049_v2 = vcombine.low %v944_v54, %v948_v55  ;;  %v1000_v54 = vld [vmem:[#allocation10 + $0x390] sm:$0xff] }
 0x357   :  { %2723 = vmatpush1.bf16.msra.mxu1 %v2995_v3  ;;  %2754 = vmatprep.mubr.bf16.mxu1 %v3821_v45  ;;  %v921_v45 = vld [vmem:[#allocation10 + $0x118] sm:$0xff]  ;;  %v3051_v3 = vcombine.low %v945_v56, %v949_v57  ;;  %v1004_v55 = vld [vmem:[#allocation10 + $0x3b0] sm:$0xff] }
 0x358   :  { %2638 = vmatprep.subr.bf16.mxu0 %v3002_v4  ;;  %2724 = vmatprep.subr.bf16.mxu1 %v3004_v5  ;;  %v3028_v30 = vcombine.high %v921_v45, %v925_v26  ;;  %v3027_v36 = vcombine.low %v921_v45, %v925_v26  ;;  %v3058_v4 = vcombine.high %v952_v62, %v956_v63  ;;  %v977_v45 = vld [vmem:[#allocation10 + $0x2d8] sm:$0xff] }
 0x359   :  { %v3060_v5 = vcombine.high %v953_v0, %v957_v1  ;;  %v981_v26 = vld [vmem:[#allocation10 + $0x2f8] sm:$0xff] }
 0x35a   :  { %2639 = vmatpush1.bf16.msra.mxu0 %v3001_v12  ;;  %v3057_v12 = vcombine.low %v952_v62, %v956_v63  ;;  %v1001_v56 = vld [vmem:[#allocation10 + $0x398] sm:$0xff]  ;;  %v1008_v62 = vld [vmem:[#allocation10 + $0x3d0] sm:$0xff] }
 0x35b   :  { %2725 = vmatpush1.bf16.msra.mxu1 %v3003_v13  ;;  %2640 = vmatprep.subr.bf16.mxu0 %v3010_v14  ;;  %v3059_v13 = vcombine.low %v953_v0, %v957_v1  ;;  %v3066_v14 = vcombine.high %v960_v6, %v964_v7  ;;  %v1005_v57 = vld [vmem:[#allocation10 + $0x3b8] sm:$0xff]  ;;  %v1012_v63 = vld [vmem:[#allocation10 + $0x3f0] sm:$0xff] }
 0x35c   :  { %2726 = vmatprep.subr.bf16.mxu1 %v3012_v15  ;;  %v3068_v15 = vcombine.high %v961_v9, %v965_v11  ;;  %v1009_v0 = vld [vmem:[#allocation10 + $0x3d8] sm:$0xff] }
 0x35d   :  { %v1013_v1 = vld [vmem:[#allocation10 + $0x3f8] sm:$0xff] }
 0x35e   :  { %2641 = vmatpush1.bf16.msra.mxu0 %v3009_v20  ;;  %v3065_v20 = vcombine.low %v960_v6, %v964_v7  ;;  %v1016_v6 = vld [vmem:[#allocation10 + $0x410] sm:$0xff] }
 0x35f   :  { %2727 = vmatpush1.bf16.msra.mxu1 %v3011_v21  ;;  %2642 = vmatprep.subr.bf16.mxu0 %v3018_v22  ;;  %v3067_v21 = vcombine.low %v961_v9, %v965_v11  ;;  %v3074_v22 = vcombine.high %v968_v16, %v972_v17  ;;  %v1020_v7 = vld [vmem:[#allocation10 + $0x430] sm:$0xff]  ;;  %v1017_v9 = vld [vmem:[#allocation10 + $0x418] sm:$0xff] }
 0x360   :  { %2728 = vmatprep.subr.bf16.mxu1 %v3020_v23  ;;  %v3076_v23 = vcombine.high %v969_v18, %v973_v19  ;;  %v1021_v11 = vld [vmem:[#allocation10 + $0x438] sm:$0xff] }
 0x362   :  { %2643 = vmatpush1.bf16.msra.mxu0 %v3017_v27  ;;  %v3073_v27 = vcombine.low %v968_v16, %v972_v17  ;;  %v1024_v16 = vld [vmem:[#allocation10 + $0x450] sm:$0xff] }
 0x363   :  { %2729 = vmatpush1.bf16.msra.mxu1 %v3019_v28  ;;  %2644 = vmatprep.subr.bf16.mxu0 %v3026_v29  ;;  %v3075_v28 = vcombine.low %v969_v18, %v973_v19  ;;  %v3082_v29 = vcombine.high %v976_v24, %v980_v25  ;;  %v1028_v17 = vld [vmem:[#allocation10 + $0x470] sm:$0xff]  ;;  %v3121_v18 = vcombine.low %v1016_v6, %v1020_v7  ;;  %v1025_v19 = vld [vmem:[#allocation10 + $0x458] sm:$0xff] }
 0x364   :  { %2730 = vmatprep.subr.bf16.mxu1 %v3028_v30  ;;  %v3084_v30 = vcombine.high %v977_v45, %v981_v26 }
 0x366   :  { %2645 = vmatpush1.bf16.msra.mxu0 %v3025_v35  ;;  %v3081_v35 = vcombine.low %v976_v24, %v980_v25  ;;  %v1036_v24 = vld [vmem:[#allocation10 + $0x4b0] sm:$0xff] }
 0x367   :  { %2731 = vmatpush1.bf16.msra.mxu1 %v3027_v36  ;;  %2646 = vmatprep.subr.bf16.mxu0 %v3034_v37  ;;  %v3083_v36 = vcombine.low %v977_v45, %v981_v26  ;;  %v3090_v37 = vcombine.high %v984_v31, %v988_v32  ;;  %v1033_v45 = vld [vmem:[#allocation10 + $0x498] sm:$0xff] }
 0x368   :  { %2732 = vmatprep.subr.bf16.mxu1 %v3036_v38  ;;  %v3092_v38 = vcombine.high %v985_v33, %v989_v34  ;;  %v1037_v26 = vld [vmem:[#allocation10 + $0x4b8] sm:$0xff] }
 0x36a   :  { %2647 = vmatpush1.bf16.msra.mxu0 %v3033_v50  ;;  %v3089_v50 = vcombine.low %v984_v31, %v988_v32  ;;  %v1040_v31 = vld [vmem:[#allocation10 + $0x4d0] sm:$0xff] }
 0x36b   :  { %2733 = vmatpush1.bf16.msra.mxu1 %v3035_v51  ;;  %2648 = vmatprep.subr.bf16.mxu0 %v3042_v52  ;;  %v3091_v51 = vcombine.low %v985_v33, %v989_v34  ;;  %v3098_v52 = vcombine.high %v992_v39, %v996_v42  ;;  %v1044_v32 = vld [vmem:[#allocation10 + $0x4f0] sm:$0xff]  ;;  %v1041_v33 = vld [vmem:[#allocation10 + $0x4d8] sm:$0xff] }
 0x36c   :  { %2734 = vmatprep.subr.bf16.mxu1 %v3044_v53  ;;  %v3100_v53 = vcombine.high %v993_v43, %v997_v44  ;;  %v1045_v34 = vld [vmem:[#allocation10 + $0x4f8] sm:$0xff] }
 0x36e   :  { %2649 = vmatpush1.bf16.msra.mxu0 %v3041_v58  ;;  %v3097_v58 = vcombine.low %v992_v39, %v996_v42  ;;  %v1052_v39 = vld [vmem:[#allocation10 + $0x530] sm:$0xff]  ;;  %v1049_v42 = vld [vmem:[#allocation10 + $0x518] sm:$0xff] }
 0x36f   :  { %2735 = vmatpush1.bf16.msra.mxu1 %v3043_v59  ;;  %2650 = vmatprep.subr.bf16.mxu0 %v3050_v60  ;;  %v3099_v59 = vcombine.low %v993_v43, %v997_v44  ;;  %v3106_v60 = vcombine.high %v1000_v54, %v1004_v55  ;;  %v1053_v43 = vld [vmem:[#allocation10 + $0x538] sm:$0xff]  ;;  %v3147_v44 = vcombine.low %v1041_v33, %v1045_v34 }
 0x370   :  { %2736 = vmatprep.subr.bf16.mxu1 %v3052_v61  ;;  %v3108_v61 = vcombine.high %v1001_v56, %v1005_v57 }
 0x372   :  { %2651 = vmatpush1.bf16.msra.mxu0 %v3049_v2  ;;  %v3105_v2 = vcombine.low %v1000_v54, %v1004_v55  ;;  %v1057_v54 = vld [vmem:[#allocation10 + $0x558] sm:$0xff] }
 0x373   :  { %2737 = vmatpush1.bf16.msra.mxu1 %v3051_v3  ;;  %2652 = vmatprep.subr.bf16.mxu0 %v3058_v4  ;;  %v3107_v3 = vcombine.low %v1001_v56, %v1005_v57  ;;  %v3114_v4 = vcombine.high %v1008_v62, %v1012_v63  ;;  %v1061_v55 = vld [vmem:[#allocation10 + $0x578] sm:$0xff]  ;;  %v3155_v57 = vcombine.low %v1049_v42, %v1053_v43 }
 0x374   :  { %2738 = vmatprep.subr.bf16.mxu1 %v3060_v5  ;;  %v3116_v5 = vcombine.high %v1009_v0, %v1013_v1 }
 0x376   :  { %2653 = vmatpush1.bf16.msra.mxu0 %v3057_v12  ;;  %v3113_v12 = vcombine.low %v1008_v62, %v1012_v63  ;;  %v1065_v62 = vld [vmem:[#allocation10 + $0x598] sm:$0xff] }
 0x377   :  { %2739 = vmatpush1.bf16.msra.mxu1 %v3059_v13  ;;  %2654 = vmatprep.subr.bf16.mxu0 %v3066_v14  ;;  %v3115_v13 = vcombine.low %v1009_v0, %v1013_v1  ;;  %v3122_v14 = vcombine.high %v1016_v6, %v1020_v7  ;;  %v1069_v63 = vld [vmem:[#allocation10 + $0x5b8] sm:$0xff]  ;;  %v3163_v1 = vcombine.low %v1057_v54, %v1061_v55 }
 0x378   :  { %2740 = vmatprep.subr.bf16.mxu1 %v3068_v15  ;;  %v3124_v15 = vcombine.high %v1017_v9, %v1021_v11  ;;  %v1073_v6 = vld [vmem:[#allocation10 + $0x5d8] sm:$0xff] }
 0x379   :  { %v1077_v7 = vld [vmem:[#allocation10 + $0x5f8] sm:$0xff] }
 0x37a   :  { %2655 = vmatpush1.bf16.msra.mxu0 %v3065_v20  ;;  %v1029_v20 = vld [vmem:[#allocation10 + $0x478] sm:$0xff] }
 0x37b   :  { %2741 = vmatpush1.bf16.msra.mxu1 %v3067_v21  ;;  %2656 = vmatprep.subr.bf16.mxu0 %v3074_v22  ;;  %v3123_v21 = vcombine.low %v1017_v9, %v1021_v11  ;;  %v3130_v22 = vcombine.high %v1024_v16, %v1028_v17  ;;  %v3132_v25 = vcombine.high %v1025_v19, %v1029_v20 }
 0x37c   :  { %2742 = vmatprep.subr.bf16.mxu1 %v3076_v23  ;;  %v1032_v23 = vld [vmem:[#allocation10 + $0x490] sm:$0xff]  ;;  %v3171_v11 = vcombine.low %v1065_v62, %v1069_v63 }
 0x37e   :  { %2657 = vmatpush1.bf16.msra.mxu0 %v3073_v27  ;;  %v3129_v27 = vcombine.low %v1024_v16, %v1028_v17  ;;  %v1081_v16 = vld [vmem:[#allocation10 + $0x618] sm:$0xff] }
 0x37f   :  { %2743 = vmatpush1.bf16.msra.mxu1 %v3075_v28  ;;  %2658 = vmatprep.subr.bf16.mxu0 %v3082_v29  ;;  %v3131_v28 = vcombine.low %v1025_v19, %v1029_v20  ;;  %v3138_v29 = vcombine.high %v1032_v23, %v1036_v24  ;;  %v1085_v17 = vld [vmem:[#allocation10 + $0x638] sm:$0xff]  ;;  %v3179_v19 = vcombine.low %v1073_v6, %v1077_v7 }
 0x380   :  { %2744 = vmatprep.subr.bf16.mxu1 %v3084_v30  ;;  %v3140_v30 = vcombine.high %v1033_v45, %v1037_v26 }
 0x382   :  { %2659 = vmatpush1.bf16.msra.mxu0 %v3081_v35  ;;  %v3137_v35 = vcombine.low %v1032_v23, %v1036_v24  ;;  %v1092_v23 = vld [vmem:[#allocation10 + $0x670] sm:$0xff]  ;;  %v1089_v24 = vld [vmem:[#allocation10 + $0x658] sm:$0xff] }
 0x383   :  { %2745 = vmatpush1.bf16.msra.mxu1 %v3083_v36  ;;  %2660 = vmatprep.subr.bf16.mxu0 %v3090_v37  ;;  %v3146_v36 = vcombine.high %v1040_v31, %v1044_v32  ;;  %v3148_v37 = vcombine.high %v1041_v33, %v1045_v34 }
 0x384   :  { %2746 = vmatprep.subr.bf16.mxu1 %v3092_v38  ;;  %v1048_v38 = vld [vmem:[#allocation10 + $0x510] sm:$0xff] }
 0x385   :  { %v3153_v56 = vcombine.low %v1048_v38, %v1052_v39 }
 0x386   :  { %2661 = vmatpush1.bf16.msra.mxu0 %v3089_v50  ;;  %v3154_v50 = vcombine.high %v1048_v38, %v1052_v39  ;;  %v1105_v38 = vld [vmem:[#allocation10 + $0x6d8] sm:$0xff] }
 0x387   :  { %2747 = vmatpush1.bf16.msra.mxu1 %v3091_v51  ;;  %2662 = vmatprep.subr.bf16.mxu0 %v3098_v52  ;;  %v3156_v51 = vcombine.high %v1049_v42, %v1053_v43  ;;  %v1056_v52 = vld [vmem:[#allocation10 + $0x550] sm:$0xff]  ;;  %v1109_v39 = vld [vmem:[#allocation10 + $0x6f8] sm:$0xff] }
 0x388   :  { %2748 = vmatprep.subr.bf16.mxu1 %v3100_v53  ;;  %v1060_v53 = vld [vmem:[#allocation10 + $0x570] sm:$0xff] }
 0x389   :  { %v3161_v0 = vcombine.low %v1056_v52, %v1060_v53 }
 0x38a   :  { %2663 = vmatpush1.bf16.msra.mxu0 %v3097_v58  ;;  %v3162_v58 = vcombine.high %v1056_v52, %v1060_v53  ;;  %v1113_v52 = vld [vmem:[#allocation10 + $0x718] sm:$0xff] }
 0x38b   :  { %2749 = vmatpush1.bf16.msra.mxu1 %v3099_v59  ;;  %2664 = vmatprep.subr.bf16.mxu0 %v3106_v60  ;;  %v3164_v59 = vcombine.high %v1057_v54, %v1061_v55  ;;  %v1064_v60 = vld [vmem:[#allocation10 + $0x590] sm:$0xff]  ;;  %v1117_v53 = vld [vmem:[#allocation10 + $0x738] sm:$0xff]  ;;  %v3211_v55 = vcombine.low %v1105_v38, %v1109_v39 }
 0x38c   :  { %2750 = vmatprep.subr.bf16.mxu1 %v3108_v61  ;;  %v1068_v61 = vld [vmem:[#allocation10 + $0x5b0] sm:$0xff] }
 0x38d   :  { %v3169_v9 = vcombine.low %v1064_v60, %v1068_v61 }
 0x38e   :  { %2665 = vmatpush1.bf16.msra.mxu0 %v3105_v2  ;;  %v3170_v2 = vcombine.high %v1064_v60, %v1068_v61  ;;  %v1121_v60 = vld [vmem:[#allocation10 + $0x758] sm:$0xff] }
 0x38f   :  { %2751 = vmatpush1.bf16.msra.mxu1 %v3107_v3  ;;  %2666 = vmatprep.subr.bf16.mxu0 %v3114_v4  ;;  %v3172_v3 = vcombine.high %v1065_v62, %v1069_v63  ;;  %v1072_v4 = vld [vmem:[#allocation10 + $0x5d0] sm:$0xff]  ;;  %v1125_v61 = vld [vmem:[#allocation10 + $0x778] sm:$0xff]  ;;  %v3219_v63 = vcombine.low %v1113_v52, %v1117_v53 }
 0x390   :  { %2752 = vmatprep.subr.bf16.mxu1 %v3116_v5  ;;  %v1076_v5 = vld [vmem:[#allocation10 + $0x5f0] sm:$0xff] }
 0x392   :  { %2667 = vmatpush1.bf16.msra.mxu0 %v3113_v12  ;;  %v3178_v12 = vcombine.high %v1072_v4, %v1076_v5 }
 0x393   :  { %2753 = vmatpush1.bf16.msra.mxu1 %v3115_v13  ;;  %2679 = vmatprep.subr.bf16.mxu0 %v3122_v14  ;;  %v3180_v13 = vcombine.high %v1073_v6, %v1077_v7  ;;  %v1080_v14 = vld [vmem:[#allocation10 + $0x610] sm:$0xff]  ;;  %v3227_v7 = vcombine.low %v1121_v60, %v1125_v61 }
 0x394   :  { %2765 = vmatprep.subr.bf16.mxu1 %v3124_v15  ;;  %v1084_v15 = vld [vmem:[#allocation10 + $0x630] sm:$0xff] }
 0x395   :  { %2669 = vmatmul.mubr.bf16.vlgmr.msra.gmra.mrb[12].mxu0 %v3817_v40  ;;  %v3186_v20 = vcombine.high %v1080_v14, %v1084_v15 }
 0x396   :  { %2755 = vmatmul.mubr.bf16.vlgmr.msra.gmra.mrb[12].mxu1 %v3817_v40  ;;  %2680 = vmatpush1.bf16.msra.mxu0 %v3121_v18  ;;  %v3139_v40 = vcombine.low %v1033_v45, %v1037_v26  ;;  %v3177_v18 = vcombine.low %v1072_v4, %v1076_v5  ;;  %v3185_v45 = vcombine.low %v1080_v14, %v1084_v15  ;;  %v1129_v4 = vld [vmem:[#allocation10 + $0x798] sm:$0xff] }
 0x397   :  { %2711 = vmatprep.mubr.bf16.mxu0 %v3823_v48  ;;  %2766 = vmatpush1.bf16.msra.mxu1 %v3123_v21  ;;  %v3188_v21 = vcombine.high %v1081_v16, %v1085_v17  ;;  %v3187_v26 = vcombine.low %v1081_v16, %v1085_v17  ;;  %v1133_v5 = vld [vmem:[#allocation10 + $0x7b8] sm:$0xff] }
 0x398   :  { %2797 = vmatprep.mubr.bf16.mxu1 %v3823_v48  ;;  %2681 = vmatprep.subr.bf16.mxu0 %v3130_v22  ;;  %v3145_v48 = vcombine.low %v1040_v31, %v1044_v32  ;;  %v1088_v22 = vld [vmem:[#allocation10 + $0x650] sm:$0xff]  ;;  %v1097_v31 = vld [vmem:[#allocation10 + $0x698] sm:$0xff]  ;;  %v3235_v17 = vcombine.low %v1129_v4, %v1133_v5 }
 0x399   :  { %2767 = vmatprep.subr.bf16.mxu1 %v3132_v25  ;;  %v1093_v25 = vld [vmem:[#allocation10 + $0x678] sm:$0xff]  ;;  %v3193_v33 = vcombine.low %v1088_v22, %v1092_v23 }
 0x39a   :  { %2682 = vmatpush1.bf16.msra.mxu0 %v3129_v27  ;;  %v3194_v27 = vcombine.high %v1088_v22, %v1092_v23  ;;  %v1101_v32 = vld [vmem:[#allocation10 + $0x6b8] sm:$0xff]  ;;  %v3195_v34 = vcombine.low %v1089_v24, %v1093_v25 }
 0x39b   :  { %2768 = vmatpush1.bf16.msra.mxu1 %v3131_v28  ;;  %2683 = vmatprep.subr.bf16.mxu0 %v3138_v29  ;;  %v3196_v28 = vcombine.high %v1089_v24, %v1093_v25  ;;  %v1096_v29 = vld [vmem:[#allocation10 + $0x690] sm:$0xff]  ;;  %v3203_v43 = vcombine.low %v1097_v31, %v1101_v32  ;;  %v1137_v14 = vld [vmem:[#allocation10 + $0x7d8] sm:$0xff] }
 0x39c   :  { %2769 = vmatprep.subr.bf16.mxu1 %v3140_v30  ;;  %v1100_v30 = vld [vmem:[#allocation10 + $0x6b0] sm:$0xff]  ;;  %v1141_v15 = vld [vmem:[#allocation10 + $0x7f8] sm:$0xff] }
 0x39d   :  { %v3201_v42 = vcombine.low %v1096_v29, %v1100_v30  ;;  %v1142_v22 = vld [vmem:[%s3877_s8] sm:$0xff]  ;;  %s3656_s8 = smov [#allocation11]  }
 0x39e   :  { %2684 = vmatpush1.bf16.msra.mxu0 %v3137_v35  ;;  %v3202_v35 = vcombine.high %v1096_v29, %v1100_v30  ;;  %v1147_v23 = vrot.slane %v1142_v22, %v3796_v47  ;;  %v1155_v24 = vrot.slane %v1142_v22, %v458_v8  ;;  %v1151_v25 = vrot.slane %v1142_v22, %v3802_v49  ;;  %s2885_s14 = sshll.u32 %s3656_s8, 4  ;;  %s2886_s14 = int_to_ptr.vmem [resolvable:$true] %s2885_s14 }
 0x39f   :  { %2770 = vmatpush1.bf16.msra.mxu1 %v3139_v40  ;;  %2685 = vmatprep.subr.bf16.mxu0 %v3146_v36  ;;  %v3204_v40 = vcombine.high %v1097_v31, %v1101_v32  ;;  %v1104_v36 = vld [vmem:[#allocation10 + $0x6d0] sm:$0xff]  ;;  %s3610_s15 = scalar_lea.vmem %s2886_s14, 1024  ;;  %p3615_p13 = scmp.lt.s32.totalorder %s2886_s14, %s2886_s14 }
 0x3a0   :  { %2771 = vmatprep.subr.bf16.mxu1 %v3148_v37  ;;  %v1108_v37 = vld [vmem:[#allocation10 + $0x6f0] sm:$0xff]  ;;  %p3611_p12 = scmp.ne.s32.totalorder %s2886_s14, %s3610_s15  ;;  %p3616_p0 = scmp.lt.s32.totalorder %s3610_s15, %s3610_s15 }
 0x3a1   :  { %v3209_v54 = vcombine.low %v1104_v36, %v1108_v37 }
 0x3a2   :  { %2686 = vmatpush1.bf16.msra.mxu0 %v3145_v48  ;;  %v3210_v48 = vcombine.high %v1104_v36, %v1108_v37  ;;  %p3617_p1 = por %p3616_p0, %p3615_p13 }
 0x3a3   :  { %2772 = vmatpush1.bf16.msra.mxu1 %v3147_v44  ;;  %2687 = vmatprep.subr.bf16.mxu0 %v3154_v50  ;;  %v3212_v44 = vcombine.high %v1105_v38, %v1109_v39  ;;  %v1112_v50 = vld [vmem:[#allocation10 + $0x710] sm:$0xff] }
 0x3a4   :  { %2773 = vmatprep.subr.bf16.mxu1 %v3156_v51  ;;  %v1116_v51 = vld [vmem:[#allocation10 + $0x730] sm:$0xff]  ;;  %p3618_p2 = pnand %p3617_p1, %p3611_p12 }
 0x3a5   :  { %v3217_v62 = vcombine.low %v1112_v50, %v1116_v51 }
 0x3a6   :  { %2688 = vmatpush1.bf16.msra.mxu0 %v3153_v56  ;;  %v3218_v56 = vcombine.high %v1112_v50, %v1116_v51 }
 0x3a7   :  { %2774 = vmatpush1.bf16.msra.mxu1 %v3155_v57  ;;  %2689 = vmatprep.subr.bf16.mxu0 %v3162_v58  ;;  %v3220_v57 = vcombine.high %v1113_v52, %v1117_v53  ;;  %v1120_v58 = vld [vmem:[#allocation10 + $0x750] sm:$0xff] }
 0x3a8   :  { %2775 = vmatprep.subr.bf16.mxu1 %v3164_v59  ;;  %v1124_v59 = vld [vmem:[#allocation10 + $0x770] sm:$0xff] }
 0x3a9   :  { %v3225_v6 = vcombine.low %v1120_v58, %v1124_v59 }
 0x3aa   :  { %2690 = vmatpush1.bf16.msra.mxu0 %v3161_v0  ;;  %v3226_v0 = vcombine.high %v1120_v58, %v1124_v59 }
 0x3ab   :  { %2776 = vmatpush1.bf16.msra.mxu1 %v3163_v1  ;;  %2691 = vmatprep.subr.bf16.mxu0 %v3170_v2  ;;  %v3228_v1 = vcombine.high %v1121_v60, %v1125_v61  ;;  %v1128_v2 = vld [vmem:[#allocation10 + $0x790] sm:$0xff] }
 0x3ac   :  { %2777 = vmatprep.subr.bf16.mxu1 %v3172_v3  ;;  %v1132_v3 = vld [vmem:[#allocation10 + $0x7b0] sm:$0xff] }
 0x3ad   :  { %v3233_v16 = vcombine.low %v1128_v2, %v1132_v3 }
 0x3ae   :  { %2692 = vmatpush1.bf16.msra.mxu0 %v3169_v9  ;;  %v3234_v9 = vcombine.high %v1128_v2, %v1132_v3 }
 0x3af   :  { %2778 = vmatpush1.bf16.msra.mxu1 %v3171_v11  ;;  %2693 = vmatprep.subr.bf16.mxu0 %v3178_v12  ;;  %v3236_v11 = vcombine.high %v1129_v4, %v1133_v5  ;;  %v1136_v12 = vld [vmem:[#allocation10 + $0x7d0] sm:$0xff] }
 0x3b0   :  { %2779 = vmatprep.subr.bf16.mxu1 %v3180_v13  ;;  %v1140_v13 = vld [vmem:[#allocation10 + $0x7f0] sm:$0xff] }
 0x3b2   :  { %2694 = vmatpush1.bf16.msra.mxu0 %v3177_v18  ;;  %v3242_v18 = vcombine.high %v1136_v12, %v1140_v13 }
 0x3b3   :  { %2780 = vmatpush1.bf16.msra.mxu1 %v3179_v19  ;;  %2695 = vmatprep.subr.bf16.mxu0 %v3186_v20  ;;  %v3244_v19 = vcombine.high %v1137_v14, %v1141_v15  ;;  %v3241_v20 = vcombine.low %v1136_v12, %v1140_v13 }
 0x3b4   :  { %2781 = vmatprep.subr.bf16.mxu1 %v3188_v21  ;;  %v3243_v21 = vcombine.low %v1137_v14, %v1141_v15 }
 0x3b6   :  { %2696 = vmatpush1.bf16.msra.mxu0 %v3185_v45  ;;  %v1159_v45 = vrot.slane %v1142_v22, %v462_v10 }
 0x3b7   :  { %2782 = vmatpush1.bf16.msra.mxu1 %v3187_v26  ;;  %2697 = vmatprep.subr.bf16.mxu0 %v3194_v27 }
 0x3b8   :  { %2783 = vmatprep.subr.bf16.mxu1 %v3196_v28 }
 0x3ba   :  { %2698 = vmatpush1.bf16.msra.mxu0 %v3193_v33 }
 0x3bb   :  { %2784 = vmatpush1.bf16.msra.mxu1 %v3195_v34  ;;  %2699 = vmatprep.subr.bf16.mxu0 %v3202_v35 }
 0x3bc   :  { %2785 = vmatprep.subr.bf16.mxu1 %v3204_v40 }
 0x3be   :  { %2700 = vmatpush1.bf16.msra.mxu0 %v3201_v42 }
 0x3bf   :  { %2786 = vmatpush1.bf16.msra.mxu1 %v3203_v43  ;;  %2701 = vmatprep.subr.bf16.mxu0 %v3210_v48 }
 0x3c0   :  { %2787 = vmatprep.subr.bf16.mxu1 %v3212_v44 }
 0x3c2   :  { %2702 = vmatpush1.bf16.msra.mxu0 %v3209_v54  ;;  %v1162_v54 = vsub.s32 4, %v3793_v46 }
 0x3c3   :  { %2788 = vmatpush1.bf16.msra.mxu1 %v3211_v55  ;;  %2703 = vmatprep.subr.bf16.mxu0 %v3218_v56  ;;  %v1170_v55 = vsub.s32 6, %v3793_v46  ;;  %v1166_v56 = vsub.s32 5, %v3793_v46 }
 0x3c4   :  { %2789 = vmatprep.subr.bf16.mxu1 %v3220_v57  ;;  %v1174_v57 = vsub.s32 7, %v3793_v46  ;;  %v1163_v58 = vrot.slane %v1142_v22, %v1162_v54 }
 0x3c5   :  { %v1171_v59 = vrot.slane %v1142_v22, %v1170_v55  ;;  %v1167_v60 = vrot.slane %v1142_v22, %v1166_v56 }
 0x3c6   :  { %2704 = vmatpush1.bf16.msra.mxu0 %v3217_v62  ;;  %v1175_v61 = vrot.slane %v1142_v22, %v1174_v57 }
 0x3c7   :  { %2790 = vmatpush1.bf16.msra.mxu1 %v3219_v63  ;;  %2705 = vmatprep.subr.bf16.mxu0 %v3226_v0 }
 0x3c8   :  { %2791 = vmatprep.subr.bf16.mxu1 %v3228_v1 }
 0x3ca   :  { %2706 = vmatpush1.bf16.msra.mxu0 %v3225_v6 }
 0x3cb   :  { %2792 = vmatpush1.bf16.msra.mxu1 %v3227_v7  ;;  %2707 = vmatprep.subr.bf16.mxu0 %v3234_v9 }
 0x3cc   :  { %2793 = vmatprep.subr.bf16.mxu1 %v3236_v11 }
 0x3ce   :  { %2708 = vmatpush1.bf16.msra.mxu0 %v3233_v16 }
 0x3cf   :  { %2794 = vmatpush1.bf16.msra.mxu1 %v3235_v17  ;;  %2709 = vmatprep.subr.bf16.mxu0 %v3242_v18 }
 0x3d0   :  { %2795 = vmatprep.subr.bf16.mxu1 %v3244_v19 }
 0x3d2   :  { %2710 = vmatpush1.bf16.msra.mxu0 %v3241_v20 }
 0x3d3   :  { %2796 = vmatpush1.bf16.msra.mxu1 %v3243_v21 }
 0x3d5   :  { %2712 = vmatmul.mubr.bf16.vlgmr.msra.gmra.mrb[12].mxu0 %v3819_v41 }
 0x3d6   :  { %2798 = vmatmul.mubr.bf16.vlgmr.msra.gmra.mrb[12].mxu1 %v3819_v41 }
 0x428   :  { %v2541_v26 = vpop.f32.mrb[8].mxu0  ;;  %v2627_v27 = vpop.f32.mrb[8].mxu1 }
 0x429   :  { %v3290_v28 = vadd.f32 %v2541_v26, %v1147_v23  ;;  %v3294_v29 = vadd.f32 %v2627_v27, %v1155_v24  ;;  %v2543_v30 = vpop.f32.mrb[9].mxu0  ;;  %v2629_v41 = vpop.f32.mrb[9].mxu1 }
 0x42a   :  { %v3291_v31 = vadd.f32 %v2543_v30, %v1151_v25  ;;  %v3295_v32 = vadd.f32 %v2629_v41, %v1159_v45  ;;  %v2545_v33 = vpop.f32.mrb[10].mxu0  ;;  %v2631_v34 = vpop.f32.mrb[10].mxu1 }
 0x42b   :  { %3468 = vtanh.f32 %v3290_v28  ;;  %v3292_v47 = vadd.f32 %v2545_v33, %v1147_v23  ;;  %v2547_v35 = vpop.f32.mrb[11].mxu0  ;;  %v2633_v40 = vpop.f32.mrb[11].mxu1  ;;  %v3296_v8 = vadd.f32 %v2631_v34, %v1155_v24 }
 0x42c   :  { %3470 = vtanh.f32 %v3294_v29  ;;  %v3293_v49 = vadd.f32 %v2547_v35, %v1151_v25  ;;  %v3297_v10 = vadd.f32 %v2633_v40, %v1159_v45 }
 0x42d   :  { %3472 = vtanh.f32 %v3291_v31 }
 0x42e   :  { %3474 = vtanh.f32 %v3295_v32 }
 0x42f   :  { %3476 = vtanh.f32 %v3292_v47 }
 0x430   :  { %3478 = vtanh.f32 %v3296_v8 }
 0x431   :  { %3480 = vtanh.f32 %v3293_v49 }
 0x432   :  { %3482 = vtanh.f32 %v3297_v10 }
 0x435   :  { %v3469_v36 = vpop.eup %3468 }
 0x436   :  { %v3471_v37 = vpop.eup %3470 }
 0x437   :  { %v3473_v38 = vpop.eup %3472 }
 0x438   :  { %v3475_v39 = vpop.eup %3474  ;;  %v3253_v42 = vpack.c.bf16 %v3473_v38, %v3469_v36 }
 0x439   :  { %v3477_v43 = vpop.eup %3476  ;;  %v3254_v48 = vpack.c.bf16 %v3475_v39, %v3471_v37 }
 0x43a   :  { %v3479_v44 = vpop.eup %3478  ;;  %2872 = vst [vmem:[#allocation11] sm:$0xff] %v3253_v42 }
 0x43b   :  { %v3481_v50 = vpop.eup %3480  ;;  %2873 = vst [vmem:[#allocation11 + $0x8] sm:$0xff] %v3254_v48 }
 0x43c   :  { %v3483_v51 = vpop.eup %3482  ;;  %v3257_v52 = vpack.c.bf16 %v3481_v50, %v3477_v43 }
 0x43d   :  { %v3258_v53 = vpack.c.bf16 %v3483_v51, %v3479_v44 }
 0x43e   :  { %2876 = vst [vmem:[#allocation11 + $0x20] sm:$0xff] %v3257_v52 }
 0x43f   :  { %2877 = vst [vmem:[#allocation11 + $0x28] sm:$0xff] %v3258_v53 }
 0x4a8   :  { %v2713_v62 = vpop.f32.mrb[12].mxu0 }
 0x4a9   :  { %v3298_v63 = vadd.f32 %v2713_v62, %v1163_v58  ;;  %v2799_v0 = vpop.f32.mrb[12].mxu1  ;;  %v2715_v1 = vpop.f32.mrb[13].mxu0 }
 0x4aa   :  { %v3302_v2 = vadd.f32 %v2799_v0, %v1171_v59  ;;  %v3299_v3 = vadd.f32 %v2715_v1, %v1167_v60  ;;  %v2801_v4 = vpop.f32.mrb[13].mxu1  ;;  %v2717_v5 = vpop.f32.mrb[14].mxu0 }
 0x4ab   :  { %3484 = vtanh.f32 %v3298_v63  ;;  %v3303_v6 = vadd.f32 %v2801_v4, %v1175_v61  ;;  %v3300_v7 = vadd.f32 %v2717_v5, %v1163_v58  ;;  %v2803_v9 = vpop.f32.mrb[14].mxu1  ;;  %v2719_v11 = vpop.f32.mrb[15].mxu0 }
 0x4ac   :  { %3486 = vtanh.f32 %v3302_v2  ;;  %v3304_v12 = vadd.f32 %v2803_v9, %v1171_v59  ;;  %v2805_v46 = vpop.f32.mrb[15].mxu1  ;;  %v3301_v13 = vadd.f32 %v2719_v11, %v1167_v60 }
 0x4ad   :  { %3488 = vtanh.f32 %v3299_v3  ;;  %v3305_v14 = vadd.f32 %v2805_v46, %v1175_v61 }
 0x4ae   :  { %3490 = vtanh.f32 %v3303_v6 }
 0x4af   :  { %3492 = vtanh.f32 %v3300_v7 }
 0x4b0   :  { %3494 = vtanh.f32 %v3304_v12 }
 0x4b1   :  { %3496 = vtanh.f32 %v3301_v13 }
 0x4b2   :  { %3498 = vtanh.f32 %v3305_v14 }
 0x4b5   :  { %v3485_v15 = vpop.eup %3484 }
 0x4b6   :  { %v3487_v16 = vpop.eup %3486 }
 0x4b7   :  { %v3489_v17 = vpop.eup %3488 }
 0x4b8   :  { %v3491_v18 = vpop.eup %3490  ;;  %v3255_v19 = vpack.c.bf16 %v3489_v17, %v3485_v15 }
 0x4b9   :  { %v3493_v20 = vpop.eup %3492  ;;  %v3256_v21 = vpack.c.bf16 %v3491_v18, %v3487_v16 }
 0x4ba   :  { %v3495_v22 = vpop.eup %3494  ;;  %2874 = vst [vmem:[#allocation11 + $0x10] sm:$0xff] %v3255_v19 }
 0x4bb   :  { %v3497_v23 = vpop.eup %3496  ;;  %2875 = vst [vmem:[#allocation11 + $0x18] sm:$0xff] %v3256_v21 }
 0x4bc   :  { %v3499_v24 = vpop.eup %3498  ;;  %v3259_v25 = vpack.c.bf16 %v3497_v23, %v3493_v20 }
 0x4bd   :  { %v3260_v45 = vpack.c.bf16 %v3499_v24, %v3495_v22 }
 0x4be   :  { %2878 = vst [vmem:[#allocation11 + $0x30] sm:$0xff] %v3259_v25 }
 0x4bf   :  { %2879 = vst [vmem:[#allocation11 + $0x38] sm:$0xff] %v3260_v45 }
 0x4c0   :  { %3621 = shalt.err (!%p3618_p2)
}
 0x4c1   :  { %s3622_s21 = scalar_lea.hbm %s3878_s9, 1024 }
 0x4c2   :  { %p3623_p3 = scmp.ne.s32.totalorder %s3878_s9, %s3622_s21  ;;  %p3626_p4 = scmp.lt.u32.totalorder %s3622_s21, %s3878_s9 }
 0x4c4   :  { %p3628_p5 = pnand %p3626_p4, %p3623_p3 }
 0x4c6   :  { %3631 = shalt.err (!%p3628_p5)
}
 0x4c7   :  { %2891 = dma.vmem_to_hbm [thread:$0]  %s2886_s14, 1024, %s3878_s9, [#allocation4], %s3651_s3, %s3651_s3, %s3652_s19  }
 0x4c8   :  { %3638 = dma.done.wait [#allocation4], 1024  }
 0x4c9   :  { %3639 = vsyncadd [#allocation4], 4294966272 }
 0x4ca   :  { %2895 = vsyncpa [#allocation3], 1 }
 0x4cb   :  { %2896 = vsyncpa [#allocation6], 1 }
 0x4cc   :  { %2897 = vsyncpa [#allocation9], 1 }
 0x4cd   :  { %2898 = vsyncpa [#allocation4], 1 }

</bundles_post_ra>
